<compile_context>
chip_gen: v5e
topology: v5e:2x2
jax: 0.10.0
libtpu: 0.0.40
codegen_flags: <defaults>
</compile_context>

<pallas_src>
import functools

import jax
import jax.numpy as jnp
from jax import lax
from jax.experimental import pallas as pl
from jax.experimental.pallas import tpu as pltpu


_FULL_UNROLL_MAX_STEPS = 32   # fully unroll the time loop below this length


def _bilstm_kernel(x_ref, wih_ref, whhf_ref, whhb_ref, b_ref, out_ref, gx_scr,
                   *, hidden):
    """Fused bidirectional single-layer LSTM over one batch tile.

    x_ref:   [L, Bt, N]  time-major input tile (bf16)
    wih_ref: [N, 8H]     input->gate weights, fwd cols 0:4H, bwd cols 4H:8H (bf16)
    whhf_ref:[H, 4H]     forward recurrent weights (bf16)
    whhb_ref:[H, 4H]     backward recurrent weights (bf16)
    b_ref:   [1, 8H]     (b_ih + b_hh) per direction, concatenated (f32)
    out_ref: [L, Bt, 2H] fwd hidden in cols 0:H, bwd hidden in cols H:2H (f32)
    gx_scr:  [L, Bt, 8H] f32 scratch with the hoisted input projection
    Gate order inside each 4H block matches PyTorch nn.LSTM: i, f, g, o.
    """
    H = hidden
    L, Bt, _ = x_ref.shape

    wih = wih_ref[...]
    whh_f = whhf_ref[...]
    whh_b = whhb_ref[...]
    bias = b_ref[...]

    # ---- Hoisted input projection (off the serial recurrence path). --------
    # One MXU push per time step covers BOTH directions (8H lanes); all pushes
    # are independent of the recurrence and pipeline back-to-back.
    def project(t):
        gx_scr[t] = (
            jnp.dot(x_ref[t], wih, preferred_element_type=jnp.float32) + bias
        )

    if L <= _FULL_UNROLL_MAX_STEPS:
        for t in range(L):
            project(t)
    else:
        def _proj_body(t, c):
            project(t)
            return c
        lax.fori_loop(0, L, _proj_body, 0, unroll=8)

    # ---- Serial recurrence: only h @ W_hh per direction per step. ----------
    def cell(gates, c):
        sg = jax.nn.sigmoid(gates)        # full-width EUP eval, then slice
        tg = jnp.tanh(gates)
        i = sg[:, 0:H]
        f = sg[:, H:2 * H]
        g = tg[:, 2 * H:3 * H]
        o = sg[:, 3 * H:4 * H]
        c_new = f * c + i * g
        h_new = o * jnp.tanh(c_new)
        return h_new, c_new

    def step(t, carry):
        h_f, c_f, h_b, c_b = carry
        tb = L - 1 - t                    # backward direction time index
        gates_f = gx_scr[t, :, 0:4 * H] + jnp.dot(
            h_f.astype(whh_f.dtype), whh_f, preferred_element_type=jnp.float32)
        gates_b = gx_scr[tb, :, 4 * H:8 * H] + jnp.dot(
            h_b.astype(whh_b.dtype), whh_b, preferred_element_type=jnp.float32)
        h_f, c_f = cell(gates_f, c_f)
        h_b, c_b = cell(gates_b, c_b)
        out_ref[t, :, 0:H] = h_f.astype(out_ref.dtype)
        out_ref[tb, :, H:2 * H] = h_b.astype(out_ref.dtype)
        return (h_f, c_f, h_b, c_b)

    z = jnp.zeros((Bt, H), jnp.float32)
    carry = (z, z, z, z)
    if L <= _FULL_UNROLL_MAX_STEPS:
        for t in range(L):
            carry = step(t, carry)
    else:
        lax.fori_loop(0, L, step, carry, unroll=8)


def _pick_batch_tile(B, L, N, H):
    """Largest batch tile that divides B, respects (8,.) tiling, fits VMEM."""
    if B % 8 != 0:
        return B                          # small batch: tile == full dim (legal block)
    bytes_per_row = L * (2 * N * 2        # x tile (bf16), double-buffered
                         + 4 * 2 * H * 2  # out tile (f32), double-buffered
                         + 4 * 8 * H)     # gx scratch (f32)
    budget = 12 * 1024 * 1024             # conservative: fits v7x 64 MiB / v5e defaults
    bt = min(B, max(8, (budget // max(bytes_per_row, 1)) // 8 * 8))
    while B % bt:
        bt -= 8
    return max(bt, 8)


def sbrnn_block_forward(x, params, hidden):
    """SBRNNBlock.forward: x:[B, L, N] -> [B, L, 2*hidden]."""
    H = hidden
    B, L, N = x.shape

    # Time-major input; bf16 MXU operands (accumulation stays f32 in-kernel).
    x_tbn = jnp.transpose(x.astype(jnp.float32), (1, 0, 2)).astype(jnp.bfloat16)
    w_ih = jnp.concatenate([params["w_ih_f"].T, params["w_ih_b"].T],
                           axis=1).astype(jnp.bfloat16)              # [N, 8H]
    w_hh_f = params["w_hh_f"].T.astype(jnp.bfloat16)                 # [H, 4H]
    w_hh_b = params["w_hh_b"].T.astype(jnp.bfloat16)                 # [H, 4H]
    bias = jnp.concatenate([params["b_ih_f"] + params["b_hh_f"],
                            params["b_ih_b"] + params["b_hh_b"]],
                           axis=0)[None, :].astype(jnp.float32)      # [1, 8H]

    bt = _pick_batch_tile(B, L, N, H)
    grid = (B // bt,)
    kernel = functools.partial(_bilstm_kernel, hidden=H)

    out_tb = pl.pallas_call(
        kernel,
        out_shape=jax.ShapeDtypeStruct((L, B, 2 * H), jnp.float32),
        grid_spec=pltpu.PrefetchScalarGridSpec(
            num_scalar_prefetch=0,
            grid=grid,
            in_specs=[
                pl.BlockSpec((L, bt, N), lambda b: (0, b, 0)),
                pl.BlockSpec((N, 8 * H), lambda b: (0, 0)),
                pl.BlockSpec((H, 4 * H), lambda b: (0, 0)),
                pl.BlockSpec((H, 4 * H), lambda b: (0, 0)),
                pl.BlockSpec((1, 8 * H), lambda b: (0, 0)),
            ],
            out_specs=pl.BlockSpec((L, bt, 2 * H), lambda b: (0, b, 0)),
            scratch_shapes=[pltpu.VMEM((L, bt, 8 * H), jnp.float32)],
        ),
        compiler_params=pltpu.CompilerParams(
            dimension_semantics=("parallel",),    # batch tiles -> 2 TCs on v7x
            vmem_limit_bytes=32 * 1024 * 1024,
        ),
    )(x_tbn, w_ih, w_hh_f, w_hh_b, bias)

    return jnp.transpose(out_tb, (1, 0, 2))                          # [B, L, 2H]


def init_sbrnn_params(key, input_size, hidden):
    """Deterministic params matching nn.LSTM(bidirectional=True) shapes/init."""
    k = 1.0 / jnp.sqrt(jnp.float32(hidden))
    names = [
        ("w_ih_f", (4 * hidden, input_size)), ("w_hh_f", (4 * hidden, hidden)),
        ("b_ih_f", (4 * hidden,)), ("b_hh_f", (4 * hidden,)),
        ("w_ih_b", (4 * hidden, input_size)), ("w_hh_b", (4 * hidden, hidden)),
        ("b_ih_b", (4 * hidden,)), ("b_hh_b", (4 * hidden,)),
    ]
    params = {}
    keys = jax.random.split(key, len(names))
    for (name, shape), kk in zip(names, keys):
        params[name] = jax.random.uniform(kk, shape, jnp.float32, minval=-k, maxval=k)
    return params


# ----------------------------- pure-JAX reference -----------------------------
def _lstm_ref_dir(x_tbn, w_ih, w_hh, b_ih, b_hh, H):
    B = x_tbn.shape[1]

    def step(carry, x_t):
        h, c = carry
        gates = x_t @ w_ih.T + h @ w_hh.T + b_ih + b_hh
        i = jax.nn.sigmoid(gates[:, 0:H])
        f = jax.nn.sigmoid(gates[:, H:2 * H])
        g = jnp.tanh(gates[:, 2 * H:3 * H])
        o = jax.nn.sigmoid(gates[:, 3 * H:4 * H])
        c = f * c + i * g
        h = o * jnp.tanh(c)
        return (h, c), h

    init = (jnp.zeros((B, H), jnp.float32), jnp.zeros((B, H), jnp.float32))
    _, hs = lax.scan(step, init, x_tbn)
    return hs


def sbrnn_block_reference(x, params, hidden):
    x = x.astype(jnp.float32)
    x_tbn = jnp.transpose(x, (1, 0, 2))
    out_f = _lstm_ref_dir(x_tbn, params["w_ih_f"], params["w_hh_f"],
                          params["b_ih_f"], params["b_hh_f"], hidden)
    out_b = _lstm_ref_dir(x_tbn[::-1], params["w_ih_b"], params["w_hh_b"],
                          params["b_ih_b"], params["b_hh_b"], hidden)[::-1]
    return jnp.transpose(jnp.concatenate([out_f, out_b], axis=-1), (1, 0, 2))


if __name__ == "__main__":
    B, L, N, H = 2, 8, 16, 32        # batch, time, input_size, hidden_channels

    key = jax.random.PRNGKey(0)
    k_x, k_p = jax.random.split(key)
    x = jax.random.normal(k_x, (B, L, N), jnp.float32)
    params = init_sbrnn_params(k_p, N, H)

    out = jax.block_until_ready(sbrnn_block_forward(x, params, H))
    assert out.shape == (B, L, 2 * H), out.shape

    ref = jax.block_until_ready(sbrnn_block_reference(x, params, H))
    max_err = float(jnp.max(jnp.abs(out - ref)))
    # bf16 MXU operands (f32 accumulation / f32 state) -> loosened tolerance.
    assert jnp.allclose(out, ref, atol=3e-2, rtol=3e-2), max_err

    print("KERNEL_OK")
</pallas_src>

<mosaic_0001>
module attributes {stable_mosaic.version = 11 : i64} {
  func.func @_bilstm_kernel(%arg0: i32, %arg1: memref<8x2x16xbf16, #tpu.memory_space<vmem>>, %arg2: memref<16x256xbf16, #tpu.memory_space<vmem>>, %arg3: memref<32x128xbf16, #tpu.memory_space<vmem>>, %arg4: memref<32x128xbf16, #tpu.memory_space<vmem>>, %arg5: memref<1x256xf32, #tpu.memory_space<vmem>>, %arg6: memref<8x2x64xf32, #tpu.memory_space<vmem>>, %arg7: memref<8x2x256xf32, #tpu.memory_space<vmem>>) attributes {dimension_semantics = [#tpu.dimension_semantics<parallel>], iteration_bounds = array<i64: 1>, scalar_prefetch = 0 : i64, scratch_operands = 1 : i64, tpu.core_type = #tpu.core_type<tc>, window_params = [{transform_indices = @transform_0, window_bounds = array<i64: 8, 2, 16>}, {pipeline_mode = #tpu.pipeline_mode<synchronous>, transform_indices = @transform_1, window_bounds = array<i64: 16, 256>}, {pipeline_mode = #tpu.pipeline_mode<synchronous>, transform_indices = @transform_2, window_bounds = array<i64: 32, 128>}, {pipeline_mode = #tpu.pipeline_mode<synchronous>, transform_indices = @transform_3, window_bounds = array<i64: 32, 128>}, {pipeline_mode = #tpu.pipeline_mode<synchronous>, transform_indices = @transform_4, window_bounds = array<i64: 1, 256>}, {transform_indices = @transform_5, window_bounds = array<i64: 8, 2, 64>}]} {
    %c0 = arith.constant 0 : index
    %c0_0 = arith.constant 0 : index
    %0 = vector.load %arg2[%c0, %c0_0] : memref<16x256xbf16, #tpu.memory_space<vmem>>, vector<16x256xbf16>
    %c0_1 = arith.constant 0 : index
    %c0_2 = arith.constant 0 : index
    %1 = vector.load %arg3[%c0_1, %c0_2] : memref<32x128xbf16, #tpu.memory_space<vmem>>, vector<32x128xbf16>
    %c0_3 = arith.constant 0 : index
    %c0_4 = arith.constant 0 : index
    %2 = vector.load %arg4[%c0_3, %c0_4] : memref<32x128xbf16, #tpu.memory_space<vmem>>, vector<32x128xbf16>
    %c0_5 = arith.constant 0 : index
    %c0_6 = arith.constant 0 : index
    %3 = vector.load %arg5[%c0_5, %c0_6] : memref<1x256xf32, #tpu.memory_space<vmem>>, vector<1x256xf32>
    %c0_7 = arith.constant 0 : index
    %c0_8 = arith.constant 0 : index
    %c0_9 = arith.constant 0 : index
    %4 = vector.load %arg1[%c0_7, %c0_8, %c0_9] : memref<8x2x16xbf16, #tpu.memory_space<vmem>>, vector<1x2x16xbf16>
    %5 = vector.shape_cast %4 : vector<1x2x16xbf16> to vector<2x16xbf16>
    %cst = arith.constant dense<0.000000e+00> : vector<2x256xf32>
    %6 = tpu.matmul %5, %0, %cst {dimension_numbers = #tpu.dot_dimension_numbers<[1], [0], [0], [1], [0, 0, 1, 1], [], []>} : vector<2x16xbf16>, vector<16x256xbf16>, vector<2x256xf32> -> vector<2x256xf32>
    %7 = vector.broadcast %3 : vector<1x256xf32> to vector<2x256xf32>
    %8 = arith.addf %6, %7 : vector<2x256xf32>
    %c0_10 = arith.constant 0 : index
    %c0_11 = arith.constant 0 : index
    %c0_12 = arith.constant 0 : index
    %9 = vector.load %arg7[%c0_10, %c0_11, %c0_12] : memref<8x2x256xf32, #tpu.memory_space<vmem>>, vector<1x2x256xf32>
    %10 = vector.shape_cast %9 : vector<1x2x256xf32> to vector<2x256xf32>
    %11 = vector.shape_cast %8 : vector<2x256xf32> to vector<1x2x256xf32>
    tpu.vector_store %arg7[%c0_10, %c0_11, %c0_12], %11 {strides = array<i32>} : memref<8x2x256xf32, #tpu.memory_space<vmem>>, vector<1x2x256xf32>,
    %c1 = arith.constant 1 : index
    %c0_13 = arith.constant 0 : index
    %c0_14 = arith.constant 0 : index
    %12 = vector.load %arg1[%c1, %c0_13, %c0_14] : memref<8x2x16xbf16, #tpu.memory_space<vmem>>, vector<1x2x16xbf16>
    %13 = vector.shape_cast %12 : vector<1x2x16xbf16> to vector<2x16xbf16>
    %cst_15 = arith.constant dense<0.000000e+00> : vector<2x256xf32>
    %14 = tpu.matmul %13, %0, %cst_15 {dimension_numbers = #tpu.dot_dimension_numbers<[1], [0], [0], [1], [0, 0, 1, 1], [], []>} : vector<2x16xbf16>, vector<16x256xbf16>, vector<2x256xf32> -> vector<2x256xf32>
    %15 = vector.broadcast %3 : vector<1x256xf32> to vector<2x256xf32>
    %16 = arith.addf %14, %15 : vector<2x256xf32>
    %c1_16 = arith.constant 1 : index
    %c0_17 = arith.constant 0 : index
    %c0_18 = arith.constant 0 : index
    %17 = vector.load %arg7[%c1_16, %c0_17, %c0_18] : memref<8x2x256xf32, #tpu.memory_space<vmem>>, vector<1x2x256xf32>
    %18 = vector.shape_cast %17 : vector<1x2x256xf32> to vector<2x256xf32>
    %19 = vector.shape_cast %16 : vector<2x256xf32> to vector<1x2x256xf32>
    tpu.vector_store %arg7[%c1_16, %c0_17, %c0_18], %19 {strides = array<i32>} : memref<8x2x256xf32, #tpu.memory_space<vmem>>, vector<1x2x256xf32>,
    %c2 = arith.constant 2 : index
    %c0_19 = arith.constant 0 : index
    %c0_20 = arith.constant 0 : index
    %20 = vector.load %arg1[%c2, %c0_19, %c0_20] : memref<8x2x16xbf16, #tpu.memory_space<vmem>>, vector<1x2x16xbf16>
    %21 = vector.shape_cast %20 : vector<1x2x16xbf16> to vector<2x16xbf16>
    %cst_21 = arith.constant dense<0.000000e+00> : vector<2x256xf32>
    %22 = tpu.matmul %21, %0, %cst_21 {dimension_numbers = #tpu.dot_dimension_numbers<[1], [0], [0], [1], [0, 0, 1, 1], [], []>} : vector<2x16xbf16>, vector<16x256xbf16>, vector<2x256xf32> -> vector<2x256xf32>
    %23 = vector.broadcast %3 : vector<1x256xf32> to vector<2x256xf32>
    %24 = arith.addf %22, %23 : vector<2x256xf32>
    %c2_22 = arith.constant 2 : index
    %c0_23 = arith.constant 0 : index
    %c0_24 = arith.constant 0 : index
    %25 = vector.load %arg7[%c2_22, %c0_23, %c0_24] : memref<8x2x256xf32, #tpu.memory_space<vmem>>, vector<1x2x256xf32>
    %26 = vector.shape_cast %25 : vector<1x2x256xf32> to vector<2x256xf32>
    %27 = vector.shape_cast %24 : vector<2x256xf32> to vector<1x2x256xf32>
    tpu.vector_store %arg7[%c2_22, %c0_23, %c0_24], %27 {strides = array<i32>} : memref<8x2x256xf32, #tpu.memory_space<vmem>>, vector<1x2x256xf32>,
    %c3 = arith.constant 3 : index
    %c0_25 = arith.constant 0 : index
    %c0_26 = arith.constant 0 : index
    %28 = vector.load %arg1[%c3, %c0_25, %c0_26] : memref<8x2x16xbf16, #tpu.memory_space<vmem>>, vector<1x2x16xbf16>
    %29 = vector.shape_cast %28 : vector<1x2x16xbf16> to vector<2x16xbf16>
    %cst_27 = arith.constant dense<0.000000e+00> : vector<2x256xf32>
    %30 = tpu.matmul %29, %0, %cst_27 {dimension_numbers = #tpu.dot_dimension_numbers<[1], [0], [0], [1], [0, 0, 1, 1], [], []>} : vector<2x16xbf16>, vector<16x256xbf16>, vector<2x256xf32> -> vector<2x256xf32>
    %31 = vector.broadcast %3 : vector<1x256xf32> to vector<2x256xf32>
    %32 = arith.addf %30, %31 : vector<2x256xf32>
    %c3_28 = arith.constant 3 : index
    %c0_29 = arith.constant 0 : index
    %c0_30 = arith.constant 0 : index
    %33 = vector.load %arg7[%c3_28, %c0_29, %c0_30] : memref<8x2x256xf32, #tpu.memory_space<vmem>>, vector<1x2x256xf32>
    %34 = vector.shape_cast %33 : vector<1x2x256xf32> to vector<2x256xf32>
    %35 = vector.shape_cast %32 : vector<2x256xf32> to vector<1x2x256xf32>
    tpu.vector_store %arg7[%c3_28, %c0_29, %c0_30], %35 {strides = array<i32>} : memref<8x2x256xf32, #tpu.memory_space<vmem>>, vector<1x2x256xf32>,
    %c4 = arith.constant 4 : index
    %c0_31 = arith.constant 0 : index
    %c0_32 = arith.constant 0 : index
    %36 = vector.load %arg1[%c4, %c0_31, %c0_32] : memref<8x2x16xbf16, #tpu.memory_space<vmem>>, vector<1x2x16xbf16>
    %37 = vector.shape_cast %36 : vector<1x2x16xbf16> to vector<2x16xbf16>
    %cst_33 = arith.constant dense<0.000000e+00> : vector<2x256xf32>
    %38 = tpu.matmul %37, %0, %cst_33 {dimension_numbers = #tpu.dot_dimension_numbers<[1], [0], [0], [1], [0, 0, 1, 1], [], []>} : vector<2x16xbf16>, vector<16x256xbf16>, vector<2x256xf32> -> vector<2x256xf32>
    %39 = vector.broadcast %3 : vector<1x256xf32> to vector<2x256xf32>
    %40 = arith.addf %38, %39 : vector<2x256xf32>
    %c4_34 = arith.constant 4 : index
    %c0_35 = arith.constant 0 : index
    %c0_36 = arith.constant 0 : index
    %41 = vector.load %arg7[%c4_34, %c0_35, %c0_36] : memref<8x2x256xf32, #tpu.memory_space<vmem>>, vector<1x2x256xf32>
    %42 = vector.shape_cast %41 : vector<1x2x256xf32> to vector<2x256xf32>
    %43 = vector.shape_cast %40 : vector<2x256xf32> to vector<1x2x256xf32>
    tpu.vector_store %arg7[%c4_34, %c0_35, %c0_36], %43 {strides = array<i32>} : memref<8x2x256xf32, #tpu.memory_space<vmem>>, vector<1x2x256xf32>,
    %c5 = arith.constant 5 : index
    %c0_37 = arith.constant 0 : index
    %c0_38 = arith.constant 0 : index
    %44 = vector.load %arg1[%c5, %c0_37, %c0_38] : memref<8x2x16xbf16, #tpu.memory_space<vmem>>, vector<1x2x16xbf16>
    %45 = vector.shape_cast %44 : vector<1x2x16xbf16> to vector<2x16xbf16>
    %cst_39 = arith.constant dense<0.000000e+00> : vector<2x256xf32>
    %46 = tpu.matmul %45, %0, %cst_39 {dimension_numbers = #tpu.dot_dimension_numbers<[1], [0], [0], [1], [0, 0, 1, 1], [], []>} : vector<2x16xbf16>, vector<16x256xbf16>, vector<2x256xf32> -> vector<2x256xf32>
    %47 = vector.broadcast %3 : vector<1x256xf32> to vector<2x256xf32>
    %48 = arith.addf %46, %47 : vector<2x256xf32>
    %c5_40 = arith.constant 5 : index
    %c0_41 = arith.constant 0 : index
    %c0_42 = arith.constant 0 : index
    %49 = vector.load %arg7[%c5_40, %c0_41, %c0_42] : memref<8x2x256xf32, #tpu.memory_space<vmem>>, vector<1x2x256xf32>
    %50 = vector.shape_cast %49 : vector<1x2x256xf32> to vector<2x256xf32>
    %51 = vector.shape_cast %48 : vector<2x256xf32> to vector<1x2x256xf32>
    tpu.vector_store %arg7[%c5_40, %c0_41, %c0_42], %51 {strides = array<i32>} : memref<8x2x256xf32, #tpu.memory_space<vmem>>, vector<1x2x256xf32>,
    %c6 = arith.constant 6 : index
    %c0_43 = arith.constant 0 : index
    %c0_44 = arith.constant 0 : index
    %52 = vector.load %arg1[%c6, %c0_43, %c0_44] : memref<8x2x16xbf16, #tpu.memory_space<vmem>>, vector<1x2x16xbf16>
    %53 = vector.shape_cast %52 : vector<1x2x16xbf16> to vector<2x16xbf16>
    %cst_45 = arith.constant dense<0.000000e+00> : vector<2x256xf32>
    %54 = tpu.matmul %53, %0, %cst_45 {dimension_numbers = #tpu.dot_dimension_numbers<[1], [0], [0], [1], [0, 0, 1, 1], [], []>} : vector<2x16xbf16>, vector<16x256xbf16>, vector<2x256xf32> -> vector<2x256xf32>
    %55 = vector.broadcast %3 : vector<1x256xf32> to vector<2x256xf32>
    %56 = arith.addf %54, %55 : vector<2x256xf32>
    %c6_46 = arith.constant 6 : index
    %c0_47 = arith.constant 0 : index
    %c0_48 = arith.constant 0 : index
    %57 = vector.load %arg7[%c6_46, %c0_47, %c0_48] : memref<8x2x256xf32, #tpu.memory_space<vmem>>, vector<1x2x256xf32>
    %58 = vector.shape_cast %57 : vector<1x2x256xf32> to vector<2x256xf32>
    %59 = vector.shape_cast %56 : vector<2x256xf32> to vector<1x2x256xf32>
    tpu.vector_store %arg7[%c6_46, %c0_47, %c0_48], %59 {strides = array<i32>} : memref<8x2x256xf32, #tpu.memory_space<vmem>>, vector<1x2x256xf32>,
    %c7 = arith.constant 7 : index
    %c0_49 = arith.constant 0 : index
    %c0_50 = arith.constant 0 : index
    %60 = vector.load %arg1[%c7, %c0_49, %c0_50] : memref<8x2x16xbf16, #tpu.memory_space<vmem>>, vector<1x2x16xbf16>
    %61 = vector.shape_cast %60 : vector<1x2x16xbf16> to vector<2x16xbf16>
    %cst_51 = arith.constant dense<0.000000e+00> : vector<2x256xf32>
    %62 = tpu.matmul %61, %0, %cst_51 {dimension_numbers = #tpu.dot_dimension_numbers<[1], [0], [0], [1], [0, 0, 1, 1], [], []>} : vector<2x16xbf16>, vector<16x256xbf16>, vector<2x256xf32> -> vector<2x256xf32>
    %63 = vector.broadcast %3 : vector<1x256xf32> to vector<2x256xf32>
    %64 = arith.addf %62, %63 : vector<2x256xf32>
    %c7_52 = arith.constant 7 : index
    %c0_53 = arith.constant 0 : index
    %c0_54 = arith.constant 0 : index
    %65 = vector.load %arg7[%c7_52, %c0_53, %c0_54] : memref<8x2x256xf32, #tpu.memory_space<vmem>>, vector<1x2x256xf32>
    %66 = vector.shape_cast %65 : vector<1x2x256xf32> to vector<2x256xf32>
    %67 = vector.shape_cast %64 : vector<2x256xf32> to vector<1x2x256xf32>
    tpu.vector_store %arg7[%c7_52, %c0_53, %c0_54], %67 {strides = array<i32>} : memref<8x2x256xf32, #tpu.memory_space<vmem>>, vector<1x2x256xf32>,
    %cst_55 = arith.constant 0.000000e+00 : f32
    %68 = vector.broadcast %cst_55 : f32 to vector<2x32xf32>
    %c0_56 = arith.constant 0 : index
    %c0_57 = arith.constant 0 : index
    %c0_58 = arith.constant 0 : index
    %69 = vector.load %arg7[%c0_56, %c0_57, %c0_58] : memref<8x2x256xf32, #tpu.memory_space<vmem>>, vector<1x2x128xf32>
    %70 = vector.shape_cast %69 : vector<1x2x128xf32> to vector<2x128xf32>
    %71 = arith.truncf %68 : vector<2x32xf32> to vector<2x32xbf16>
    %cst_59 = arith.constant dense<0.000000e+00> : vector<2x128xf32>
    %72 = tpu.matmul %71, %1, %cst_59 {dimension_numbers = #tpu.dot_dimension_numbers<[1], [0], [0], [1], [0, 0, 1, 1], [], []>} : vector<2x32xbf16>, vector<32x128xbf16>, vector<2x128xf32> -> vector<2x128xf32>
    %73 = arith.addf %70, %72 : vector<2x128xf32>
    %c7_60 = arith.constant 7 : index
    %c0_61 = arith.constant 0 : index
    %c128 = arith.constant 128 : index
    %74 = vector.load %arg7[%c7_60, %c0_61, %c128] : memref<8x2x256xf32, #tpu.memory_space<vmem>>, vector<1x2x128xf32>
    %75 = vector.shape_cast %74 : vector<1x2x128xf32> to vector<2x128xf32>
    %76 = arith.truncf %68 : vector<2x32xf32> to vector<2x32xbf16>
    %cst_62 = arith.constant dense<0.000000e+00> : vector<2x128xf32>
    %77 = tpu.matmul %76, %2, %cst_62 {dimension_numbers = #tpu.dot_dimension_numbers<[1], [0], [0], [1], [0, 0, 1, 1], [], []>} : vector<2x32xbf16>, vector<32x128xbf16>, vector<2x128xf32> -> vector<2x128xf32>
    %78 = arith.addf %75, %77 : vector<2x128xf32>
    %79 = arith.negf %73 : vector<2x128xf32>
    %80 = math.exp %79 : vector<2x128xf32>
    %cst_63 = arith.constant 1.000000e+00 : f32
    %81 = vector.broadcast %cst_63 : f32 to vector<2x128xf32>
    %82 = arith.addf %81, %80 : vector<2x128xf32>
    %83 = arith.divf %81, %82 : vector<2x128xf32>
    %84 = math.tanh %73 : vector<2x128xf32>
    %85 = vector.extract_strided_slice %83 {offsets = [0, 0], sizes = [2, 32], strides = [1, 1]} : vector<2x128xf32> to vector<2x32xf32>
    %86 = vector.extract_strided_slice %83 {offsets = [0, 32], sizes = [2, 32], strides = [1, 1]} : vector<2x128xf32> to vector<2x32xf32>
    %87 = vector.extract_strided_slice %84 {offsets = [0, 64], sizes = [2, 32], strides = [1, 1]} : vector<2x128xf32> to vector<2x32xf32>
    %88 = vector.extract_strided_slice %83 {offsets = [0, 96], sizes = [2, 32], strides = [1, 1]} : vector<2x128xf32> to vector<2x32xf32>
    %89 = arith.mulf %86, %68 : vector<2x32xf32>
    %90 = arith.mulf %85, %87 : vector<2x32xf32>
    %91 = arith.addf %89, %90 : vector<2x32xf32>
    %92 = math.tanh %91 : vector<2x32xf32>
    %93 = arith.mulf %88, %92 : vector<2x32xf32>
    %94 = arith.negf %78 : vector<2x128xf32>
    %95 = math.exp %94 : vector<2x128xf32>
    %cst_64 = arith.constant 1.000000e+00 : f32
    %96 = vector.broadcast %cst_64 : f32 to vector<2x128xf32>
    %97 = arith.addf %96, %95 : vector<2x128xf32>
    %98 = arith.divf %96, %97 : vector<2x128xf32>
    %99 = math.tanh %78 : vector<2x128xf32>
    %100 = vector.extract_strided_slice %98 {offsets = [0, 0], sizes = [2, 32], strides = [1, 1]} : vector<2x128xf32> to vector<2x32xf32>
    %101 = vector.extract_strided_slice %98 {offsets = [0, 32], sizes = [2, 32], strides = [1, 1]} : vector<2x128xf32> to vector<2x32xf32>
    %102 = vector.extract_strided_slice %99 {offsets = [0, 64], sizes = [2, 32], strides = [1, 1]} : vector<2x128xf32> to vector<2x32xf32>
    %103 = vector.extract_strided_slice %98 {offsets = [0, 96], sizes = [2, 32], strides = [1, 1]} : vector<2x128xf32> to vector<2x32xf32>
    %104 = arith.mulf %101, %68 : vector<2x32xf32>
    %105 = arith.mulf %100, %102 : vector<2x32xf32>
    %106 = arith.addf %104, %105 : vector<2x32xf32>
    %107 = math.tanh %106 : vector<2x32xf32>
    %108 = arith.mulf %103, %107 : vector<2x32xf32>
    %c0_65 = arith.constant 0 : index
    %c0_66 = arith.constant 0 : index
    %c0_67 = arith.constant 0 : index
    %109 = vector.load %arg6[%c0_65, %c0_66, %c0_67] : memref<8x2x64xf32, #tpu.memory_space<vmem>>, vector<1x2x32xf32>
    %110 = vector.shape_cast %109 : vector<1x2x32xf32> to vector<2x32xf32>
    %111 = vector.shape_cast %93 : vector<2x32xf32> to vector<1x2x32xf32>
    tpu.vector_store %arg6[%c0_65, %c0_66, %c0_67], %111 {strides = array<i32>} : memref<8x2x64xf32, #tpu.memory_space<vmem>>, vector<1x2x32xf32>,
    %c7_68 = arith.constant 7 : index
    %c0_69 = arith.constant 0 : index
    %c32 = arith.constant 32 : index
    %112 = vector.load %arg6[%c7_68, %c0_69, %c32] : memref<8x2x64xf32, #tpu.memory_space<vmem>>, vector<1x2x32xf32>
    %113 = vector.shape_cast %112 : vector<1x2x32xf32> to vector<2x32xf32>
    %114 = vector.shape_cast %108 : vector<2x32xf32> to vector<1x2x32xf32>
    tpu.vector_store %arg6[%c7_68, %c0_69, %c32], %114 {strides = array<i32>} : memref<8x2x64xf32, #tpu.memory_space<vmem>>, vector<1x2x32xf32>,
    %c1_70 = arith.constant 1 : index
    %c0_71 = arith.constant 0 : index
    %c0_72 = arith.constant 0 : index
    %115 = vector.load %arg7[%c1_70, %c0_71, %c0_72] : memref<8x2x256xf32, #tpu.memory_space<vmem>>, vector<1x2x128xf32>
    %116 = vector.shape_cast %115 : vector<1x2x128xf32> to vector<2x128xf32>
    %117 = arith.truncf %93 : vector<2x32xf32> to vector<2x32xbf16>
    %cst_73 = arith.constant dense<0.000000e+00> : vector<2x128xf32>
    %118 = tpu.matmul %117, %1, %cst_73 {dimension_numbers = #tpu.dot_dimension_numbers<[1], [0], [0], [1], [0, 0, 1, 1], [], []>} : vector<2x32xbf16>, vector<32x128xbf16>, vector<2x128xf32> -> vector<2x128xf32>
    %119 = arith.addf %116, %118 : vector<2x128xf32>
    %c6_74 = arith.constant 6 : index
    %c0_75 = arith.constant 0 : index
    %c128_76 = arith.constant 128 : index
    %120 = vector.load %arg7[%c6_74, %c0_75, %c128_76] : memref<8x2x256xf32, #tpu.memory_space<vmem>>, vector<1x2x128xf32>
    %121 = vector.shape_cast %120 : vector<1x2x128xf32> to vector<2x128xf32>
    %122 = arith.truncf %108 : vector<2x32xf32> to vector<2x32xbf16>
    %cst_77 = arith.constant dense<0.000000e+00> : vector<2x128xf32>
    %123 = tpu.matmul %122, %2, %cst_77 {dimension_numbers = #tpu.dot_dimension_numbers<[1], [0], [0], [1], [0, 0, 1, 1], [], []>} : vector<2x32xbf16>, vector<32x128xbf16>, vector<2x128xf32> -> vector<2x128xf32>
    %124 = arith.addf %121, %123 : vector<2x128xf32>
    %125 = arith.negf %119 : vector<2x128xf32>
    %126 = math.exp %125 : vector<2x128xf32>
    %cst_78 = arith.constant 1.000000e+00 : f32
    %127 = vector.broadcast %cst_78 : f32 to vector<2x128xf32>
    %128 = arith.addf %127, %126 : vector<2x128xf32>
    %129 = arith.divf %127, %128 : vector<2x128xf32>
    %130 = math.tanh %119 : vector<2x128xf32>
    %131 = vector.extract_strided_slice %129 {offsets = [0, 0], sizes = [2, 32], strides = [1, 1]} : vector<2x128xf32> to vector<2x32xf32>
    %132 = vector.extract_strided_slice %129 {offsets = [0, 32], sizes = [2, 32], strides = [1, 1]} : vector<2x128xf32> to vector<2x32xf32>
    %133 = vector.extract_strided_slice %130 {offsets = [0, 64], sizes = [2, 32], strides = [1, 1]} : vector<2x128xf32> to vector<2x32xf32>
    %134 = vector.extract_strided_slice %129 {offsets = [0, 96], sizes = [2, 32], strides = [1, 1]} : vector<2x128xf32> to vector<2x32xf32>
    %135 = arith.mulf %132, %91 : vector<2x32xf32>
    %136 = arith.mulf %131, %133 : vector<2x32xf32>
    %137 = arith.addf %135, %136 : vector<2x32xf32>
    %138 = math.tanh %137 : vector<2x32xf32>
    %139 = arith.mulf %134, %138 : vector<2x32xf32>
    %140 = arith.negf %124 : vector<2x128xf32>
    %141 = math.exp %140 : vector<2x128xf32>
    %cst_79 = arith.constant 1.000000e+00 : f32
    %142 = vector.broadcast %cst_79 : f32 to vector<2x128xf32>
    %143 = arith.addf %142, %141 : vector<2x128xf32>
    %144 = arith.divf %142, %143 : vector<2x128xf32>
    %145 = math.tanh %124 : vector<2x128xf32>
    %146 = vector.extract_strided_slice %144 {offsets = [0, 0], sizes = [2, 32], strides = [1, 1]} : vector<2x128xf32> to vector<2x32xf32>
    %147 = vector.extract_strided_slice %144 {offsets = [0, 32], sizes = [2, 32], strides = [1, 1]} : vector<2x128xf32> to vector<2x32xf32>
    %148 = vector.extract_strided_slice %145 {offsets = [0, 64], sizes = [2, 32], strides = [1, 1]} : vector<2x128xf32> to vector<2x32xf32>
    %149 = vector.extract_strided_slice %144 {offsets = [0, 96], sizes = [2, 32], strides = [1, 1]} : vector<2x128xf32> to vector<2x32xf32>
    %150 = arith.mulf %147, %106 : vector<2x32xf32>
    %151 = arith.mulf %146, %148 : vector<2x32xf32>
    %152 = arith.addf %150, %151 : vector<2x32xf32>
    %153 = math.tanh %152 : vector<2x32xf32>
    %154 = arith.mulf %149, %153 : vector<2x32xf32>
    %c1_80 = arith.constant 1 : index
    %c0_81 = arith.constant 0 : index
    %c0_82 = arith.constant 0 : index
    %155 = vector.load %arg6[%c1_80, %c0_81, %c0_82] : memref<8x2x64xf32, #tpu.memory_space<vmem>>, vector<1x2x32xf32>
    %156 = vector.shape_cast %155 : vector<1x2x32xf32> to vector<2x32xf32>
    %157 = vector.shape_cast %139 : vector<2x32xf32> to vector<1x2x32xf32>
    tpu.vector_store %arg6[%c1_80, %c0_81, %c0_82], %157 {strides = array<i32>} : memref<8x2x64xf32, #tpu.memory_space<vmem>>, vector<1x2x32xf32>,
    %c6_83 = arith.constant 6 : index
    %c0_84 = arith.constant 0 : index
    %c32_85 = arith.constant 32 : index
    %158 = vector.load %arg6[%c6_83, %c0_84, %c32_85] : memref<8x2x64xf32, #tpu.memory_space<vmem>>, vector<1x2x32xf32>
    %159 = vector.shape_cast %158 : vector<1x2x32xf32> to vector<2x32xf32>
    %160 = vector.shape_cast %154 : vector<2x32xf32> to vector<1x2x32xf32>
    tpu.vector_store %arg6[%c6_83, %c0_84, %c32_85], %160 {strides = array<i32>} : memref<8x2x64xf32, #tpu.memory_space<vmem>>, vector<1x2x32xf32>,
    %c2_86 = arith.constant 2 : index
    %c0_87 = arith.constant 0 : index
    %c0_88 = arith.constant 0 : index
    %161 = vector.load %arg7[%c2_86, %c0_87, %c0_88] : memref<8x2x256xf32, #tpu.memory_space<vmem>>, vector<1x2x128xf32>
    %162 = vector.shape_cast %161 : vector<1x2x128xf32> to vector<2x128xf32>
    %163 = arith.truncf %139 : vector<2x32xf32> to vector<2x32xbf16>
    %cst_89 = arith.constant dense<0.000000e+00> : vector<2x128xf32>
    %164 = tpu.matmul %163, %1, %cst_89 {dimension_numbers = #tpu.dot_dimension_numbers<[1], [0], [0], [1], [0, 0, 1, 1], [], []>} : vector<2x32xbf16>, vector<32x128xbf16>, vector<2x128xf32> -> vector<2x128xf32>
    %165 = arith.addf %162, %164 : vector<2x128xf32>
    %c5_90 = arith.constant 5 : index
    %c0_91 = arith.constant 0 : index
    %c128_92 = arith.constant 128 : index
    %166 = vector.load %arg7[%c5_90, %c0_91, %c128_92] : memref<8x2x256xf32, #tpu.memory_space<vmem>>, vector<1x2x128xf32>
    %167 = vector.shape_cast %166 : vector<1x2x128xf32> to vector<2x128xf32>
    %168 = arith.truncf %154 : vector<2x32xf32> to vector<2x32xbf16>
    %cst_93 = arith.constant dense<0.000000e+00> : vector<2x128xf32>
    %169 = tpu.matmul %168, %2, %cst_93 {dimension_numbers = #tpu.dot_dimension_numbers<[1], [0], [0], [1], [0, 0, 1, 1], [], []>} : vector<2x32xbf16>, vector<32x128xbf16>, vector<2x128xf32> -> vector<2x128xf32>
    %170 = arith.addf %167, %169 : vector<2x128xf32>
    %171 = arith.negf %165 : vector<2x128xf32>
    %172 = math.exp %171 : vector<2x128xf32>
    %cst_94 = arith.constant 1.000000e+00 : f32
    %173 = vector.broadcast %cst_94 : f32 to vector<2x128xf32>
    %174 = arith.addf %173, %172 : vector<2x128xf32>
    %175 = arith.divf %173, %174 : vector<2x128xf32>
    %176 = math.tanh %165 : vector<2x128xf32>
    %177 = vector.extract_strided_slice %175 {offsets = [0, 0], sizes = [2, 32], strides = [1, 1]} : vector<2x128xf32> to vector<2x32xf32>
    %178 = vector.extract_strided_slice %175 {offsets = [0, 32], sizes = [2, 32], strides = [1, 1]} : vector<2x128xf32> to vector<2x32xf32>
    %179 = vector.extract_strided_slice %176 {offsets = [0, 64], sizes = [2, 32], strides = [1, 1]} : vector<2x128xf32> to vector<2x32xf32>
    %180 = vector.extract_strided_slice %175 {offsets = [0, 96], sizes = [2, 32], strides = [1, 1]} : vector<2x128xf32> to vector<2x32xf32>
    %181 = arith.mulf %178, %137 : vector<2x32xf32>
    %182 = arith.mulf %177, %179 : vector<2x32xf32>
    %183 = arith.addf %181, %182 : vector<2x32xf32>
    %184 = math.tanh %183 : vector<2x32xf32>
    %185 = arith.mulf %180, %184 : vector<2x32xf32>
    %186 = arith.negf %170 : vector<2x128xf32>
    %187 = math.exp %186 : vector<2x128xf32>
    %cst_95 = arith.constant 1.000000e+00 : f32
    %188 = vector.broadcast %cst_95 : f32 to vector<2x128xf32>
    %189 = arith.addf %188, %187 : vector<2x128xf32>
    %190 = arith.divf %188, %189 : vector<2x128xf32>
    %191 = math.tanh %170 : vector<2x128xf32>
    %192 = vector.extract_strided_slice %190 {offsets = [0, 0], sizes = [2, 32], strides = [1, 1]} : vector<2x128xf32> to vector<2x32xf32>
    %193 = vector.extract_strided_slice %190 {offsets = [0, 32], sizes = [2, 32], strides = [1, 1]} : vector<2x128xf32> to vector<2x32xf32>
    %194 = vector.extract_strided_slice %191 {offsets = [0, 64], sizes = [2, 32], strides = [1, 1]} : vector<2x128xf32> to vector<2x32xf32>
    %195 = vector.extract_strided_slice %190 {offsets = [0, 96], sizes = [2, 32], strides = [1, 1]} : vector<2x128xf32> to vector<2x32xf32>
    %196 = arith.mulf %193, %152 : vector<2x32xf32>
    %197 = arith.mulf %192, %194 : vector<2x32xf32>
    %198 = arith.addf %196, %197 : vector<2x32xf32>
    %199 = math.tanh %198 : vector<2x32xf32>
    %200 = arith.mulf %195, %199 : vector<2x32xf32>
    %c2_96 = arith.constant 2 : index
    %c0_97 = arith.constant 0 : index
    %c0_98 = arith.constant 0 : index
    %201 = vector.load %arg6[%c2_96, %c0_97, %c0_98] : memref<8x2x64xf32, #tpu.memory_space<vmem>>, vector<1x2x32xf32>
    %202 = vector.shape_cast %201 : vector<1x2x32xf32> to vector<2x32xf32>
    %203 = vector.shape_cast %185 : vector<2x32xf32> to vector<1x2x32xf32>
    tpu.vector_store %arg6[%c2_96, %c0_97, %c0_98], %203 {strides = array<i32>} : memref<8x2x64xf32, #tpu.memory_space<vmem>>, vector<1x2x32xf32>,
    %c5_99 = arith.constant 5 : index
    %c0_100 = arith.constant 0 : index
    %c32_101 = arith.constant 32 : index
    %204 = vector.load %arg6[%c5_99, %c0_100, %c32_101] : memref<8x2x64xf32, #tpu.memory_space<vmem>>, vector<1x2x32xf32>
    %205 = vector.shape_cast %204 : vector<1x2x32xf32> to vector<2x32xf32>
    %206 = vector.shape_cast %200 : vector<2x32xf32> to vector<1x2x32xf32>
    tpu.vector_store %arg6[%c5_99, %c0_100, %c32_101], %206 {strides = array<i32>} : memref<8x2x64xf32, #tpu.memory_space<vmem>>, vector<1x2x32xf32>,
    %c3_102 = arith.constant 3 : index
    %c0_103 = arith.constant 0 : index
    %c0_104 = arith.constant 0 : index
    %207 = vector.load %arg7[%c3_102, %c0_103, %c0_104] : memref<8x2x256xf32, #tpu.memory_space<vmem>>, vector<1x2x128xf32>
    %208 = vector.shape_cast %207 : vector<1x2x128xf32> to vector<2x128xf32>
    %209 = arith.truncf %185 : vector<2x32xf32> to vector<2x32xbf16>
    %cst_105 = arith.constant dense<0.000000e+00> : vector<2x128xf32>
    %210 = tpu.matmul %209, %1, %cst_105 {dimension_numbers = #tpu.dot_dimension_numbers<[1], [0], [0], [1], [0, 0, 1, 1], [], []>} : vector<2x32xbf16>, vector<32x128xbf16>, vector<2x128xf32> -> vector<2x128xf32>
    %211 = arith.addf %208, %210 : vector<2x128xf32>
    %c4_106 = arith.constant 4 : index
    %c0_107 = arith.constant 0 : index
    %c128_108 = arith.constant 128 : index
    %212 = vector.load %arg7[%c4_106, %c0_107, %c128_108] : memref<8x2x256xf32, #tpu.memory_space<vmem>>, vector<1x2x128xf32>
    %213 = vector.shape_cast %212 : vector<1x2x128xf32> to vector<2x128xf32>
    %214 = arith.truncf %200 : vector<2x32xf32> to vector<2x32xbf16>
    %cst_109 = arith.constant dense<0.000000e+00> : vector<2x128xf32>
    %215 = tpu.matmul %214, %2, %cst_109 {dimension_numbers = #tpu.dot_dimension_numbers<[1], [0], [0], [1], [0, 0, 1, 1], [], []>} : vector<2x32xbf16>, vector<32x128xbf16>, vector<2x128xf32> -> vector<2x128xf32>
    %216 = arith.addf %213, %215 : vector<2x128xf32>
    %217 = arith.negf %211 : vector<2x128xf32>
    %218 = math.exp %217 : vector<2x128xf32>
    %cst_110 = arith.constant 1.000000e+00 : f32
    %219 = vector.broadcast %cst_110 : f32 to vector<2x128xf32>
    %220 = arith.addf %219, %218 : vector<2x128xf32>
    %221 = arith.divf %219, %220 : vector<2x128xf32>
    %222 = math.tanh %211 : vector<2x128xf32>
    %223 = vector.extract_strided_slice %221 {offsets = [0, 0], sizes = [2, 32], strides = [1, 1]} : vector<2x128xf32> to vector<2x32xf32>
    %224 = vector.extract_strided_slice %221 {offsets = [0, 32], sizes = [2, 32], strides = [1, 1]} : vector<2x128xf32> to vector<2x32xf32>
    %225 = vector.extract_strided_slice %222 {offsets = [0, 64], sizes = [2, 32], strides = [1, 1]} : vector<2x128xf32> to vector<2x32xf32>
    %226 = vector.extract_strided_slice %221 {offsets = [0, 96], sizes = [2, 32], strides = [1, 1]} : vector<2x128xf32> to vector<2x32xf32>
    %227 = arith.mulf %224, %183 : vector<2x32xf32>
    %228 = arith.mulf %223, %225 : vector<2x32xf32>
    %229 = arith.addf %227, %228 : vector<2x32xf32>
    %230 = math.tanh %229 : vector<2x32xf32>
    %231 = arith.mulf %226, %230 : vector<2x32xf32>
    %232 = arith.negf %216 : vector<2x128xf32>
    %233 = math.exp %232 : vector<2x128xf32>
    %cst_111 = arith.constant 1.000000e+00 : f32
    %234 = vector.broadcast %cst_111 : f32 to vector<2x128xf32>
    %235 = arith.addf %234, %233 : vector<2x128xf32>
    %236 = arith.divf %234, %235 : vector<2x128xf32>
    %237 = math.tanh %216 : vector<2x128xf32>
    %238 = vector.extract_strided_slice %236 {offsets = [0, 0], sizes = [2, 32], strides = [1, 1]} : vector<2x128xf32> to vector<2x32xf32>
    %239 = vector.extract_strided_slice %236 {offsets = [0, 32], sizes = [2, 32], strides = [1, 1]} : vector<2x128xf32> to vector<2x32xf32>
    %240 = vector.extract_strided_slice %237 {offsets = [0, 64], sizes = [2, 32], strides = [1, 1]} : vector<2x128xf32> to vector<2x32xf32>
    %241 = vector.extract_strided_slice %236 {offsets = [0, 96], sizes = [2, 32], strides = [1, 1]} : vector<2x128xf32> to vector<2x32xf32>
    %242 = arith.mulf %239, %198 : vector<2x32xf32>
    %243 = arith.mulf %238, %240 : vector<2x32xf32>
    %244 = arith.addf %242, %243 : vector<2x32xf32>
    %245 = math.tanh %244 : vector<2x32xf32>
    %246 = arith.mulf %241, %245 : vector<2x32xf32>
    %c3_112 = arith.constant 3 : index
    %c0_113 = arith.constant 0 : index
    %c0_114 = arith.constant 0 : index
    %247 = vector.load %arg6[%c3_112, %c0_113, %c0_114] : memref<8x2x64xf32, #tpu.memory_space<vmem>>, vector<1x2x32xf32>
    %248 = vector.shape_cast %247 : vector<1x2x32xf32> to vector<2x32xf32>
    %249 = vector.shape_cast %231 : vector<2x32xf32> to vector<1x2x32xf32>
    tpu.vector_store %arg6[%c3_112, %c0_113, %c0_114], %249 {strides = array<i32>} : memref<8x2x64xf32, #tpu.memory_space<vmem>>, vector<1x2x32xf32>,
    %c4_115 = arith.constant 4 : index
    %c0_116 = arith.constant 0 : index
    %c32_117 = arith.constant 32 : index
    %250 = vector.load %arg6[%c4_115, %c0_116, %c32_117] : memref<8x2x64xf32, #tpu.memory_space<vmem>>, vector<1x2x32xf32>
    %251 = vector.shape_cast %250 : vector<1x2x32xf32> to vector<2x32xf32>
    %252 = vector.shape_cast %246 : vector<2x32xf32> to vector<1x2x32xf32>
    tpu.vector_store %arg6[%c4_115, %c0_116, %c32_117], %252 {strides = array<i32>} : memref<8x2x64xf32, #tpu.memory_space<vmem>>, vector<1x2x32xf32>,
    %c4_118 = arith.constant 4 : index
    %c0_119 = arith.constant 0 : index
    %c0_120 = arith.constant 0 : index
    %253 = vector.load %arg7[%c4_118, %c0_119, %c0_120] : memref<8x2x256xf32, #tpu.memory_space<vmem>>, vector<1x2x128xf32>
    %254 = vector.shape_cast %253 : vector<1x2x128xf32> to vector<2x128xf32>
    %255 = arith.truncf %231 : vector<2x32xf32> to vector<2x32xbf16>
    %cst_121 = arith.constant dense<0.000000e+00> : vector<2x128xf32>
    %256 = tpu.matmul %255, %1, %cst_121 {dimension_numbers = #tpu.dot_dimension_numbers<[1], [0], [0], [1], [0, 0, 1, 1], [], []>} : vector<2x32xbf16>, vector<32x128xbf16>, vector<2x128xf32> -> vector<2x128xf32>
    %257 = arith.addf %254, %256 : vector<2x128xf32>
    %c3_122 = arith.constant 3 : index
    %c0_123 = arith.constant 0 : index
    %c128_124 = arith.constant 128 : index
    %258 = vector.load %arg7[%c3_122, %c0_123, %c128_124] : memref<8x2x256xf32, #tpu.memory_space<vmem>>, vector<1x2x128xf32>
    %259 = vector.shape_cast %258 : vector<1x2x128xf32> to vector<2x128xf32>
    %260 = arith.truncf %246 : vector<2x32xf32> to vector<2x32xbf16>
    %cst_125 = arith.constant dense<0.000000e+00> : vector<2x128xf32>
    %261 = tpu.matmul %260, %2, %cst_125 {dimension_numbers = #tpu.dot_dimension_numbers<[1], [0], [0], [1], [0, 0, 1, 1], [], []>} : vector<2x32xbf16>, vector<32x128xbf16>, vector<2x128xf32> -> vector<2x128xf32>
    %262 = arith.addf %259, %261 : vector<2x128xf32>
    %263 = arith.negf %257 : vector<2x128xf32>
    %264 = math.exp %263 : vector<2x128xf32>
    %cst_126 = arith.constant 1.000000e+00 : f32
    %265 = vector.broadcast %cst_126 : f32 to vector<2x128xf32>
    %266 = arith.addf %265, %264 : vector<2x128xf32>
    %267 = arith.divf %265, %266 : vector<2x128xf32>
    %268 = math.tanh %257 : vector<2x128xf32>
    %269 = vector.extract_strided_slice %267 {offsets = [0, 0], sizes = [2, 32], strides = [1, 1]} : vector<2x128xf32> to vector<2x32xf32>
    %270 = vector.extract_strided_slice %267 {offsets = [0, 32], sizes = [2, 32], strides = [1, 1]} : vector<2x128xf32> to vector<2x32xf32>
    %271 = vector.extract_strided_slice %268 {offsets = [0, 64], sizes = [2, 32], strides = [1, 1]} : vector<2x128xf32> to vector<2x32xf32>
    %272 = vector.extract_strided_slice %267 {offsets = [0, 96], sizes = [2, 32], strides = [1, 1]} : vector<2x128xf32> to vector<2x32xf32>
    %273 = arith.mulf %270, %229 : vector<2x32xf32>
    %274 = arith.mulf %269, %271 : vector<2x32xf32>
    %275 = arith.addf %273, %274 : vector<2x32xf32>
    %276 = math.tanh %275 : vector<2x32xf32>
    %277 = arith.mulf %272, %276 : vector<2x32xf32>
    %278 = arith.negf %262 : vector<2x128xf32>
    %279 = math.exp %278 : vector<2x128xf32>
    %cst_127 = arith.constant 1.000000e+00 : f32
    %280 = vector.broadcast %cst_127 : f32 to vector<2x128xf32>
    %281 = arith.addf %280, %279 : vector<2x128xf32>
    %282 = arith.divf %280, %281 : vector<2x128xf32>
    %283 = math.tanh %262 : vector<2x128xf32>
    %284 = vector.extract_strided_slice %282 {offsets = [0, 0], sizes = [2, 32], strides = [1, 1]} : vector<2x128xf32> to vector<2x32xf32>
    %285 = vector.extract_strided_slice %282 {offsets = [0, 32], sizes = [2, 32], strides = [1, 1]} : vector<2x128xf32> to vector<2x32xf32>
    %286 = vector.extract_strided_slice %283 {offsets = [0, 64], sizes = [2, 32], strides = [1, 1]} : vector<2x128xf32> to vector<2x32xf32>
    %287 = vector.extract_strided_slice %282 {offsets = [0, 96], sizes = [2, 32], strides = [1, 1]} : vector<2x128xf32> to vector<2x32xf32>
    %288 = arith.mulf %285, %244 : vector<2x32xf32>
    %289 = arith.mulf %284, %286 : vector<2x32xf32>
    %290 = arith.addf %288, %289 : vector<2x32xf32>
    %291 = math.tanh %290 : vector<2x32xf32>
    %292 = arith.mulf %287, %291 : vector<2x32xf32>
    %c4_128 = arith.constant 4 : index
    %c0_129 = arith.constant 0 : index
    %c0_130 = arith.constant 0 : index
    %293 = vector.load %arg6[%c4_128, %c0_129, %c0_130] : memref<8x2x64xf32, #tpu.memory_space<vmem>>, vector<1x2x32xf32>
    %294 = vector.shape_cast %293 : vector<1x2x32xf32> to vector<2x32xf32>
    %295 = vector.shape_cast %277 : vector<2x32xf32> to vector<1x2x32xf32>
    tpu.vector_store %arg6[%c4_128, %c0_129, %c0_130], %295 {strides = array<i32>} : memref<8x2x64xf32, #tpu.memory_space<vmem>>, vector<1x2x32xf32>,
    %c3_131 = arith.constant 3 : index
    %c0_132 = arith.constant 0 : index
    %c32_133 = arith.constant 32 : index
    %296 = vector.load %arg6[%c3_131, %c0_132, %c32_133] : memref<8x2x64xf32, #tpu.memory_space<vmem>>, vector<1x2x32xf32>
    %297 = vector.shape_cast %296 : vector<1x2x32xf32> to vector<2x32xf32>
    %298 = vector.shape_cast %292 : vector<2x32xf32> to vector<1x2x32xf32>
    tpu.vector_store %arg6[%c3_131, %c0_132, %c32_133], %298 {strides = array<i32>} : memref<8x2x64xf32, #tpu.memory_space<vmem>>, vector<1x2x32xf32>,
    %c5_134 = arith.constant 5 : index
    %c0_135 = arith.constant 0 : index
    %c0_136 = arith.constant 0 : index
    %299 = vector.load %arg7[%c5_134, %c0_135, %c0_136] : memref<8x2x256xf32, #tpu.memory_space<vmem>>, vector<1x2x128xf32>
    %300 = vector.shape_cast %299 : vector<1x2x128xf32> to vector<2x128xf32>
    %301 = arith.truncf %277 : vector<2x32xf32> to vector<2x32xbf16>
    %cst_137 = arith.constant dense<0.000000e+00> : vector<2x128xf32>
    %302 = tpu.matmul %301, %1, %cst_137 {dimension_numbers = #tpu.dot_dimension_numbers<[1], [0], [0], [1], [0, 0, 1, 1], [], []>} : vector<2x32xbf16>, vector<32x128xbf16>, vector<2x128xf32> -> vector<2x128xf32>
    %303 = arith.addf %300, %302 : vector<2x128xf32>
    %c2_138 = arith.constant 2 : index
    %c0_139 = arith.constant 0 : index
    %c128_140 = arith.constant 128 : index
    %304 = vector.load %arg7[%c2_138, %c0_139, %c128_140] : memref<8x2x256xf32, #tpu.memory_space<vmem>>, vector<1x2x128xf32>
    %305 = vector.shape_cast %304 : vector<1x2x128xf32> to vector<2x128xf32>
    %306 = arith.truncf %292 : vector<2x32xf32> to vector<2x32xbf16>
    %cst_141 = arith.constant dense<0.000000e+00> : vector<2x128xf32>
    %307 = tpu.matmul %306, %2, %cst_141 {dimension_numbers = #tpu.dot_dimension_numbers<[1], [0], [0], [1], [0, 0, 1, 1], [], []>} : vector<2x32xbf16>, vector<32x128xbf16>, vector<2x128xf32> -> vector<2x128xf32>
    %308 = arith.addf %305, %307 : vector<2x128xf32>
    %309 = arith.negf %303 : vector<2x128xf32>
    %310 = math.exp %309 : vector<2x128xf32>
    %cst_142 = arith.constant 1.000000e+00 : f32
    %311 = vector.broadcast %cst_142 : f32 to vector<2x128xf32>
    %312 = arith.addf %311, %310 : vector<2x128xf32>
    %313 = arith.divf %311, %312 : vector<2x128xf32>
    %314 = math.tanh %303 : vector<2x128xf32>
    %315 = vector.extract_strided_slice %313 {offsets = [0, 0], sizes = [2, 32], strides = [1, 1]} : vector<2x128xf32> to vector<2x32xf32>
    %316 = vector.extract_strided_slice %313 {offsets = [0, 32], sizes = [2, 32], strides = [1, 1]} : vector<2x128xf32> to vector<2x32xf32>
    %317 = vector.extract_strided_slice %314 {offsets = [0, 64], sizes = [2, 32], strides = [1, 1]} : vector<2x128xf32> to vector<2x32xf32>
    %318 = vector.extract_strided_slice %313 {offsets = [0, 96], sizes = [2, 32], strides = [1, 1]} : vector<2x128xf32> to vector<2x32xf32>
    %319 = arith.mulf %316, %275 : vector<2x32xf32>
    %320 = arith.mulf %315, %317 : vector<2x32xf32>
    %321 = arith.addf %319, %320 : vector<2x32xf32>
    %322 = math.tanh %321 : vector<2x32xf32>
    %323 = arith.mulf %318, %322 : vector<2x32xf32>
    %324 = arith.negf %308 : vector<2x128xf32>
    %325 = math.exp %324 : vector<2x128xf32>
    %cst_143 = arith.constant 1.000000e+00 : f32
    %326 = vector.broadcast %cst_143 : f32 to vector<2x128xf32>
    %327 = arith.addf %326, %325 : vector<2x128xf32>
    %328 = arith.divf %326, %327 : vector<2x128xf32>
    %329 = math.tanh %308 : vector<2x128xf32>
    %330 = vector.extract_strided_slice %328 {offsets = [0, 0], sizes = [2, 32], strides = [1, 1]} : vector<2x128xf32> to vector<2x32xf32>
    %331 = vector.extract_strided_slice %328 {offsets = [0, 32], sizes = [2, 32], strides = [1, 1]} : vector<2x128xf32> to vector<2x32xf32>
    %332 = vector.extract_strided_slice %329 {offsets = [0, 64], sizes = [2, 32], strides = [1, 1]} : vector<2x128xf32> to vector<2x32xf32>
    %333 = vector.extract_strided_slice %328 {offsets = [0, 96], sizes = [2, 32], strides = [1, 1]} : vector<2x128xf32> to vector<2x32xf32>
    %334 = arith.mulf %331, %290 : vector<2x32xf32>
    %335 = arith.mulf %330, %332 : vector<2x32xf32>
    %336 = arith.addf %334, %335 : vector<2x32xf32>
    %337 = math.tanh %336 : vector<2x32xf32>
    %338 = arith.mulf %333, %337 : vector<2x32xf32>
    %c5_144 = arith.constant 5 : index
    %c0_145 = arith.constant 0 : index
    %c0_146 = arith.constant 0 : index
    %339 = vector.load %arg6[%c5_144, %c0_145, %c0_146] : memref<8x2x64xf32, #tpu.memory_space<vmem>>, vector<1x2x32xf32>
    %340 = vector.shape_cast %339 : vector<1x2x32xf32> to vector<2x32xf32>
    %341 = vector.shape_cast %323 : vector<2x32xf32> to vector<1x2x32xf32>
    tpu.vector_store %arg6[%c5_144, %c0_145, %c0_146], %341 {strides = array<i32>} : memref<8x2x64xf32, #tpu.memory_space<vmem>>, vector<1x2x32xf32>,
    %c2_147 = arith.constant 2 : index
    %c0_148 = arith.constant 0 : index
    %c32_149 = arith.constant 32 : index
    %342 = vector.load %arg6[%c2_147, %c0_148, %c32_149] : memref<8x2x64xf32, #tpu.memory_space<vmem>>, vector<1x2x32xf32>
    %343 = vector.shape_cast %342 : vector<1x2x32xf32> to vector<2x32xf32>
    %344 = vector.shape_cast %338 : vector<2x32xf32> to vector<1x2x32xf32>
    tpu.vector_store %arg6[%c2_147, %c0_148, %c32_149], %344 {strides = array<i32>} : memref<8x2x64xf32, #tpu.memory_space<vmem>>, vector<1x2x32xf32>,
    %c6_150 = arith.constant 6 : index
    %c0_151 = arith.constant 0 : index
    %c0_152 = arith.constant 0 : index
    %345 = vector.load %arg7[%c6_150, %c0_151, %c0_152] : memref<8x2x256xf32, #tpu.memory_space<vmem>>, vector<1x2x128xf32>
    %346 = vector.shape_cast %345 : vector<1x2x128xf32> to vector<2x128xf32>
    %347 = arith.truncf %323 : vector<2x32xf32> to vector<2x32xbf16>
    %cst_153 = arith.constant dense<0.000000e+00> : vector<2x128xf32>
    %348 = tpu.matmul %347, %1, %cst_153 {dimension_numbers = #tpu.dot_dimension_numbers<[1], [0], [0], [1], [0, 0, 1, 1], [], []>} : vector<2x32xbf16>, vector<32x128xbf16>, vector<2x128xf32> -> vector<2x128xf32>
    %349 = arith.addf %346, %348 : vector<2x128xf32>
    %c1_154 = arith.constant 1 : index
    %c0_155 = arith.constant 0 : index
    %c128_156 = arith.constant 128 : index
    %350 = vector.load %arg7[%c1_154, %c0_155, %c128_156] : memref<8x2x256xf32, #tpu.memory_space<vmem>>, vector<1x2x128xf32>
    %351 = vector.shape_cast %350 : vector<1x2x128xf32> to vector<2x128xf32>
    %352 = arith.truncf %338 : vector<2x32xf32> to vector<2x32xbf16>
    %cst_157 = arith.constant dense<0.000000e+00> : vector<2x128xf32>
    %353 = tpu.matmul %352, %2, %cst_157 {dimension_numbers = #tpu.dot_dimension_numbers<[1], [0], [0], [1], [0, 0, 1, 1], [], []>} : vector<2x32xbf16>, vector<32x128xbf16>, vector<2x128xf32> -> vector<2x128xf32>
    %354 = arith.addf %351, %353 : vector<2x128xf32>
    %355 = arith.negf %349 : vector<2x128xf32>
    %356 = math.exp %355 : vector<2x128xf32>
    %cst_158 = arith.constant 1.000000e+00 : f32
    %357 = vector.broadcast %cst_158 : f32 to vector<2x128xf32>
    %358 = arith.addf %357, %356 : vector<2x128xf32>
    %359 = arith.divf %357, %358 : vector<2x128xf32>
    %360 = math.tanh %349 : vector<2x128xf32>
    %361 = vector.extract_strided_slice %359 {offsets = [0, 0], sizes = [2, 32], strides = [1, 1]} : vector<2x128xf32> to vector<2x32xf32>
    %362 = vector.extract_strided_slice %359 {offsets = [0, 32], sizes = [2, 32], strides = [1, 1]} : vector<2x128xf32> to vector<2x32xf32>
    %363 = vector.extract_strided_slice %360 {offsets = [0, 64], sizes = [2, 32], strides = [1, 1]} : vector<2x128xf32> to vector<2x32xf32>
    %364 = vector.extract_strided_slice %359 {offsets = [0, 96], sizes = [2, 32], strides = [1, 1]} : vector<2x128xf32> to vector<2x32xf32>
    %365 = arith.mulf %362, %321 : vector<2x32xf32>
    %366 = arith.mulf %361, %363 : vector<2x32xf32>
    %367 = arith.addf %365, %366 : vector<2x32xf32>
    %368 = math.tanh %367 : vector<2x32xf32>
    %369 = arith.mulf %364, %368 : vector<2x32xf32>
    %370 = arith.negf %354 : vector<2x128xf32>
    %371 = math.exp %370 : vector<2x128xf32>
    %cst_159 = arith.constant 1.000000e+00 : f32
    %372 = vector.broadcast %cst_159 : f32 to vector<2x128xf32>
    %373 = arith.addf %372, %371 : vector<2x128xf32>
    %374 = arith.divf %372, %373 : vector<2x128xf32>
    %375 = math.tanh %354 : vector<2x128xf32>
    %376 = vector.extract_strided_slice %374 {offsets = [0, 0], sizes = [2, 32], strides = [1, 1]} : vector<2x128xf32> to vector<2x32xf32>
    %377 = vector.extract_strided_slice %374 {offsets = [0, 32], sizes = [2, 32], strides = [1, 1]} : vector<2x128xf32> to vector<2x32xf32>
    %378 = vector.extract_strided_slice %375 {offsets = [0, 64], sizes = [2, 32], strides = [1, 1]} : vector<2x128xf32> to vector<2x32xf32>
    %379 = vector.extract_strided_slice %374 {offsets = [0, 96], sizes = [2, 32], strides = [1, 1]} : vector<2x128xf32> to vector<2x32xf32>
    %380 = arith.mulf %377, %336 : vector<2x32xf32>
    %381 = arith.mulf %376, %378 : vector<2x32xf32>
    %382 = arith.addf %380, %381 : vector<2x32xf32>
    %383 = math.tanh %382 : vector<2x32xf32>
    %384 = arith.mulf %379, %383 : vector<2x32xf32>
    %c6_160 = arith.constant 6 : index
    %c0_161 = arith.constant 0 : index
    %c0_162 = arith.constant 0 : index
    %385 = vector.load %arg6[%c6_160, %c0_161, %c0_162] : memref<8x2x64xf32, #tpu.memory_space<vmem>>, vector<1x2x32xf32>
    %386 = vector.shape_cast %385 : vector<1x2x32xf32> to vector<2x32xf32>
    %387 = vector.shape_cast %369 : vector<2x32xf32> to vector<1x2x32xf32>
    tpu.vector_store %arg6[%c6_160, %c0_161, %c0_162], %387 {strides = array<i32>} : memref<8x2x64xf32, #tpu.memory_space<vmem>>, vector<1x2x32xf32>,
    %c1_163 = arith.constant 1 : index
    %c0_164 = arith.constant 0 : index
    %c32_165 = arith.constant 32 : index
    %388 = vector.load %arg6[%c1_163, %c0_164, %c32_165] : memref<8x2x64xf32, #tpu.memory_space<vmem>>, vector<1x2x32xf32>
    %389 = vector.shape_cast %388 : vector<1x2x32xf32> to vector<2x32xf32>
    %390 = vector.shape_cast %384 : vector<2x32xf32> to vector<1x2x32xf32>
    tpu.vector_store %arg6[%c1_163, %c0_164, %c32_165], %390 {strides = array<i32>} : memref<8x2x64xf32, #tpu.memory_space<vmem>>, vector<1x2x32xf32>,
    %c7_166 = arith.constant 7 : index
    %c0_167 = arith.constant 0 : index
    %c0_168 = arith.constant 0 : index
    %391 = vector.load %arg7[%c7_166, %c0_167, %c0_168] : memref<8x2x256xf32, #tpu.memory_space<vmem>>, vector<1x2x128xf32>
    %392 = vector.shape_cast %391 : vector<1x2x128xf32> to vector<2x128xf32>
    %393 = arith.truncf %369 : vector<2x32xf32> to vector<2x32xbf16>
    %cst_169 = arith.constant dense<0.000000e+00> : vector<2x128xf32>
    %394 = tpu.matmul %393, %1, %cst_169 {dimension_numbers = #tpu.dot_dimension_numbers<[1], [0], [0], [1], [0, 0, 1, 1], [], []>} : vector<2x32xbf16>, vector<32x128xbf16>, vector<2x128xf32> -> vector<2x128xf32>
    %395 = arith.addf %392, %394 : vector<2x128xf32>
    %c0_170 = arith.constant 0 : index
    %c0_171 = arith.constant 0 : index
    %c128_172 = arith.constant 128 : index
    %396 = vector.load %arg7[%c0_170, %c0_171, %c128_172] : memref<8x2x256xf32, #tpu.memory_space<vmem>>, vector<1x2x128xf32>
    %397 = vector.shape_cast %396 : vector<1x2x128xf32> to vector<2x128xf32>
    %398 = arith.truncf %384 : vector<2x32xf32> to vector<2x32xbf16>
    %cst_173 = arith.constant dense<0.000000e+00> : vector<2x128xf32>
    %399 = tpu.matmul %398, %2, %cst_173 {dimension_numbers = #tpu.dot_dimension_numbers<[1], [0], [0], [1], [0, 0, 1, 1], [], []>} : vector<2x32xbf16>, vector<32x128xbf16>, vector<2x128xf32> -> vector<2x128xf32>
    %400 = arith.addf %397, %399 : vector<2x128xf32>
    %401 = arith.negf %395 : vector<2x128xf32>
    %402 = math.exp %401 : vector<2x128xf32>
    %cst_174 = arith.constant 1.000000e+00 : f32
    %403 = vector.broadcast %cst_174 : f32 to vector<2x128xf32>
    %404 = arith.addf %403, %402 : vector<2x128xf32>
    %405 = arith.divf %403, %404 : vector<2x128xf32>
    %406 = math.tanh %395 : vector<2x128xf32>
    %407 = vector.extract_strided_slice %405 {offsets = [0, 0], sizes = [2, 32], strides = [1, 1]} : vector<2x128xf32> to vector<2x32xf32>
    %408 = vector.extract_strided_slice %405 {offsets = [0, 32], sizes = [2, 32], strides = [1, 1]} : vector<2x128xf32> to vector<2x32xf32>
    %409 = vector.extract_strided_slice %406 {offsets = [0, 64], sizes = [2, 32], strides = [1, 1]} : vector<2x128xf32> to vector<2x32xf32>
    %410 = vector.extract_strided_slice %405 {offsets = [0, 96], sizes = [2, 32], strides = [1, 1]} : vector<2x128xf32> to vector<2x32xf32>
    %411 = arith.mulf %408, %367 : vector<2x32xf32>
    %412 = arith.mulf %407, %409 : vector<2x32xf32>
    %413 = arith.addf %411, %412 : vector<2x32xf32>
    %414 = math.tanh %413 : vector<2x32xf32>
    %415 = arith.mulf %410, %414 : vector<2x32xf32>
    %416 = arith.negf %400 : vector<2x128xf32>
    %417 = math.exp %416 : vector<2x128xf32>
    %cst_175 = arith.constant 1.000000e+00 : f32
    %418 = vector.broadcast %cst_175 : f32 to vector<2x128xf32>
    %419 = arith.addf %418, %417 : vector<2x128xf32>
    %420 = arith.divf %418, %419 : vector<2x128xf32>
    %421 = math.tanh %400 : vector<2x128xf32>
    %422 = vector.extract_strided_slice %420 {offsets = [0, 0], sizes = [2, 32], strides = [1, 1]} : vector<2x128xf32> to vector<2x32xf32>
    %423 = vector.extract_strided_slice %420 {offsets = [0, 32], sizes = [2, 32], strides = [1, 1]} : vector<2x128xf32> to vector<2x32xf32>
    %424 = vector.extract_strided_slice %421 {offsets = [0, 64], sizes = [2, 32], strides = [1, 1]} : vector<2x128xf32> to vector<2x32xf32>
    %425 = vector.extract_strided_slice %420 {offsets = [0, 96], sizes = [2, 32], strides = [1, 1]} : vector<2x128xf32> to vector<2x32xf32>
    %426 = arith.mulf %423, %382 : vector<2x32xf32>
    %427 = arith.mulf %422, %424 : vector<2x32xf32>
    %428 = arith.addf %426, %427 : vector<2x32xf32>
    %429 = math.tanh %428 : vector<2x32xf32>
    %430 = arith.mulf %425, %429 : vector<2x32xf32>
    %c7_176 = arith.constant 7 : index
    %c0_177 = arith.constant 0 : index
    %c0_178 = arith.constant 0 : index
    %431 = vector.load %arg6[%c7_176, %c0_177, %c0_178] : memref<8x2x64xf32, #tpu.memory_space<vmem>>, vector<1x2x32xf32>
    %432 = vector.shape_cast %431 : vector<1x2x32xf32> to vector<2x32xf32>
    %433 = vector.shape_cast %415 : vector<2x32xf32> to vector<1x2x32xf32>
    tpu.vector_store %arg6[%c7_176, %c0_177, %c0_178], %433 {strides = array<i32>} : memref<8x2x64xf32, #tpu.memory_space<vmem>>, vector<1x2x32xf32>,
    %c0_179 = arith.constant 0 : index
    %c0_180 = arith.constant 0 : index
    %c32_181 = arith.constant 32 : index
    %434 = vector.load %arg6[%c0_179, %c0_180, %c32_181] : memref<8x2x64xf32, #tpu.memory_space<vmem>>, vector<1x2x32xf32>
    %435 = vector.shape_cast %434 : vector<1x2x32xf32> to vector<2x32xf32>
    %436 = vector.shape_cast %430 : vector<2x32xf32> to vector<1x2x32xf32>
    tpu.vector_store %arg6[%c0_179, %c0_180, %c32_181], %436 {strides = array<i32>} : memref<8x2x64xf32, #tpu.memory_space<vmem>>, vector<1x2x32xf32>,
    return
  }
  func.func @transform_0(%arg0: i32) -> (i32, i32, i32) {
    %c0_i32 = arith.constant 0 : i32
    %c0_i32_0 = arith.constant 0 : i32
    %c0_i32_1 = arith.constant 0 : i32
    return %c0_i32, %arg0, %c0_i32_0 : i32, i32, i32
  }
  func.func @transform_1(%arg0: i32) -> (i32, i32) {
    %c0_i32 = arith.constant 0 : i32
    %c0_i32_0 = arith.constant 0 : i32
    %c0_i32_1 = arith.constant 0 : i32
    return %c0_i32, %c0_i32_0 : i32, i32
  }
  func.func @transform_2(%arg0: i32) -> (i32, i32) {
    %c0_i32 = arith.constant 0 : i32
    %c0_i32_0 = arith.constant 0 : i32
    %c0_i32_1 = arith.constant 0 : i32
    return %c0_i32, %c0_i32_0 : i32, i32
  }
  func.func @transform_3(%arg0: i32) -> (i32, i32) {
    %c0_i32 = arith.constant 0 : i32
    %c0_i32_0 = arith.constant 0 : i32
    %c0_i32_1 = arith.constant 0 : i32
    return %c0_i32, %c0_i32_0 : i32, i32
  }
  func.func @transform_4(%arg0: i32) -> (i32, i32) {
    %c0_i32 = arith.constant 0 : i32
    %c0_i32_0 = arith.constant 0 : i32
    %c0_i32_1 = arith.constant 0 : i32
    return %c0_i32, %c0_i32_0 : i32, i32
  }
  func.func @transform_5(%arg0: i32) -> (i32, i32, i32) {
    %c0_i32 = arith.constant 0 : i32
    %c0_i32_0 = arith.constant 0 : i32
    %c0_i32_1 = arith.constant 0 : i32
    return %c0_i32, %arg0, %c0_i32_0 : i32, i32, i32
  }
}

</mosaic_0001>

<bundles_post_ra>
// kernel: tpu_custom_call.1
= control target key start
LH: loop header
LB: loop body
LE: loop exit
PB: predicated region body
PF: predicated region fallthrough
CT: control target
= control target key end

     0   :  { %10 = vsyncpa [#allocation4], 0  ;;  %s2216_s0 = inlined_call_operand.hbm [shape: bf16[8,2,16], index: 0, kind: input, shape index: {}]   ;;  %s2217_s1 = inlined_call_operand.hbm [shape: bf16[16,256], index: 1, kind: input, shape index: {}]   ;;  %s2218_s2 = inlined_call_operand.hbm [shape: bf16[32,128], index: 2, kind: input, shape index: {}]   ;;  %s2219_s3 = inlined_call_operand.hbm [shape: bf16[32,128], index: 3, kind: input, shape index: {}]   ;;  %s2220_s4 = inlined_call_operand.vmem [shape: f32[1,256], index: 4, kind: input, shape index: {}]   ;;  %s2221_s5 = inlined_call_operand.hbm [shape: f32[8,2,64], index: 5, kind: output, shape index: {}]  }
   0x1   :  { %11 = vsyncpa [#allocation7], 0 }
   0x2   :  { %12 = vsyncpa [#allocation10], 0  ;;  %s31_s20 = sshll.u32 %s2217_s1, 4  ;;  %s32_s20 = int_to_ptr.hbm [resolvable:$true] %s31_s20 }
   0x3   :  { %13 = vsyncpa [#allocation5], 0  ;;  %s1861_s21 = smov [#allocation6]   ;;  %s18_s25 = sshll.u32 %s2216_s0, 4  ;;  %s19_s25 = int_to_ptr.hbm [resolvable:$true] %s18_s25 }
   0x4   :  { %s33_s22 = sshll.u32 %s1861_s21, 4  ;;  %s1862_s26 = smov 128   ;;  %s34_s22 = int_to_ptr.vmem [resolvable:$true] %s33_s22 }
   0x5   :  { %s1863_s27 = smov 8   ;;  %s1864_s28 = smov [#allocation3]  }
   0x6   :  { %39 = dma.hbm_to_vmem [thread:$0]  %s32_s20, 256, %s34_s22, [#allocation7], %s1862_s26, %s1862_s26, %s1863_s27  }
   0x7   :  { %s20_s29 = sshll.u32 %s1864_s28, 4  ;;  %s1865_s30 = smov 16   ;;  %s21_s29 = int_to_ptr.vmem [resolvable:$true] %s20_s29 }
   0x8   :  { %s1866_s6 = smov 1   ;;  %s44_s8 = sshll.u32 %s2218_s2, 4  ;;  %s45_s8 = int_to_ptr.hbm [resolvable:$true] %s44_s8 }
   0x9   :  { %26 = dma.hbm_to_vmem [thread:$0]  %s19_s25, 128, %s21_s29, [#allocation4], %s1865_s30, %s1865_s30, %s1866_s6  }
   0xa   :  { %s1867_s9 = smov [#allocation8]   ;;  %s57_s12 = sshll.u32 %s2219_s3, 4  ;;  %s58_s12 = int_to_ptr.hbm [resolvable:$true] %s57_s12 }
   0xb   :  { %s46_s10 = sshll.u32 %s1867_s9, 4  ;;  %s1868_s13 = smov 64   ;;  %s47_s10 = int_to_ptr.vmem [resolvable:$true] %s46_s10 }
   0xc   :  { %s1869_s14 = smov 4   ;;  %s1870_s15 = smov [#allocation9]  }
   0xd   :  { %52 = dma.hbm_to_vmem [thread:$0]  %s45_s8, 256, %s47_s10, [#allocation7], %s1868_s13, %s1868_s13, %s1869_s14  }
   0xe   :  { %s59_s16 = sshll.u32 %s1870_s15, 4  ;;  %s60_s16 = int_to_ptr.vmem [resolvable:$true] %s59_s16 }
   0xf   :  { %65 = dma.hbm_to_vmem [thread:$0]  %s58_s12, 256, %s60_s16, [#allocation10], %s1868_s13, %s1868_s13, %s1869_s14  }
  0x10   :  { %1853 = dma.done.wait [#allocation4], 128  }
  0x11   :  { %1854 = vsyncadd [#allocation4], 4294967168 }
  0x12   :  { %1855 = dma.done.wait [#allocation7], 512  }
  0x13   :  { %1856 = vsyncadd [#allocation7], 4294966784 }
  0x14   :  { %1857 = dma.done.wait [#allocation10], 256  }
  0x15   :  { %1858 = vsyncadd [#allocation10], 4294967040  ;;  %v1517_v0 = vld [vmem:[#allocation6] sm:$0xf]  ;;  %v1586_v1 = vld [vmem:[#allocation6 + $0x4] sm:$0xf0] }
  0x16   :  { %v1585_v2 = vld [vmem:[#allocation6 + $0x4] sm:$0xf]  ;;  %v1518_v3 = vor.u32 %v1586_v1, %v1517_v0  ;;  %v1519_v4 = vld [vmem:[#allocation6 + $0x8] sm:$0xf0]  ;;  %v96_v6 = vld [vmem:[#allocation3] sm:$0x1] }
  0x17   :  { %v1522_v5 = vor.u32 %v1585_v2, %v1519_v4  ;;  %vm112_vm0 = vcmask 130048   ;;  %v150_v7 = vld [vmem:[#allocation3 + $0x1] sm:$0x1]  ;;  %v188_v8 = vld [vmem:[#allocation3 + $0x2] sm:$0x1]  ;;  %v1933_v13 = vld [vmem:[#allocation9 + $0x8] sm:$0xff] }
  0x18   :  { %123 = vmatpush.bf16.msra.mxu0 %v1518_v3  ;;  %161 = vmatpush.bf16.msra.mxu2 %v1518_v3  ;;  %v226_v9 = vld [vmem:[#allocation3 + $0x3] sm:$0x1]  ;;  %v264_v10 = vld [vmem:[#allocation3 + $0x4] sm:$0x1]  ;;  %v302_v12 = vld [vmem:[#allocation3 + $0x5] sm:$0x1] }
  0x19   :  { %136 = vmatpush.bf16.msra.mxu1 %v1522_v5  ;;  %174 = vmatpush.bf16.msra.mxu3 %v1522_v5  ;;  %v1929_v11 = vld [vmem:[#allocation8 + $0x8] sm:$0xff]  ;;  %v1937_v14 = vld [vmem:[#allocation8] sm:$0xff]  ;;  %v1941_v15 = vld [vmem:[#allocation9] sm:$0xff]  ;;  %v1871_v18 = vmov 0   ;;  %vm145_vm1 = vcmask 1041408   ;;  %vm428_vm10 = vcmask 261120  }
  0x1a   :  { %v340_v16 = vld [vmem:[#allocation3 + $0x6] sm:$0x1]  ;;  %v378_v17 = vld [vmem:[#allocation3 + $0x7] sm:$0x1]  ;;  %v95_v19 = vld [vmem:[%s2220_s4] sm:$0x3] }
  0x1b   :  { %1523 = vmatmul.msk.bf16.vlgmr.msra.gmra.mxu0 %vm112_vm0, %v96_v6  ;;  %1525 = vmatmul.msk.bf16.vlgmr.msra.gmra.mxu2 %vm112_vm0, %v150_v7  ;;  %v1968_v20 = vperm.slane %v95_v19, 1  ;;  %v1970_v21 = vperm.slane %v95_v19, 0  ;;  %s1872_s4 = smov 32   ;;  %s1873_s17 = smov [#allocation11]  }
  0x1c   :  { %199 = vmatpush.bf16.msrb.mxu0 %v1518_v3  ;;  %1524 = vmatmul.msk.bf16.vlgmr.msra.gmra.mxu1 %vm112_vm0, %v96_v6  ;;  %s1498_s18 = sshll.u32 %s1873_s17, 4  ;;  %s1500_s21 = sshll.u32 %s2221_s5, 4  ;;  %s1499_s18 = int_to_ptr.vmem [resolvable:$true] %s1498_s18  ;;  %s1501_s21 = int_to_ptr.hbm [resolvable:$true] %s1500_s21 }
  0x1d   :  { %212 = vmatpush.bf16.msrb.mxu1 %v1522_v5  ;;  %1526 = vmatmul.msk.bf16.vlgmr.msra.gmra.mxu3 %vm112_vm0, %v150_v7  ;;  %s1874_s22 = smov 2  }
  0x1e   :  { %237 = vmatpush.bf16.msrb.mxu2 %v1518_v3  ;;  %250 = vmatpush.bf16.msrb.mxu3 %v1522_v5 }
  0x20   :  { %275 = vmatpush.bf16.msra.mxu0 %v1518_v3 }
  0x21   :  { %288 = vmatpush.bf16.msra.mxu1 %v1522_v5 }
  0x22   :  { %326 = vmatpush.bf16.msra.mxu3 %v1522_v5  ;;  %313 = vmatpush.bf16.msra.mxu2 %v1518_v3 }
  0x2b   :  { %1527 = vmatmul.msk.bf16.vlgmr.msrb.gmra.mxu0 %vm112_vm0, %v188_v8  ;;  %1529 = vmatmul.msk.bf16.vlgmr.msrb.gmra.mxu2 %vm112_vm0, %v226_v9 }
  0x2c   :  { %1528 = vmatmul.msk.bf16.vlgmr.msrb.gmra.mxu1 %vm112_vm0, %v188_v8  ;;  %351 = vmatpush.bf16.msrb.mxu0 %v1518_v3 }
  0x2d   :  { %1530 = vmatmul.msk.bf16.vlgmr.msrb.gmra.mxu3 %vm112_vm0, %v226_v9  ;;  %364 = vmatpush.bf16.msrb.mxu1 %v1522_v5 }
  0x2e   :  { %402 = vmatpush.bf16.msrb.mxu3 %v1522_v5  ;;  %389 = vmatpush.bf16.msrb.mxu2 %v1518_v3 }
  0x3b   :  { %1531 = vmatmul.msk.bf16.vlgmr.msra.gmra.mxu0 %vm112_vm0, %v264_v10  ;;  %1533 = vmatmul.msk.bf16.vlgmr.msra.gmra.mxu2 %vm112_vm0, %v302_v12 }
  0x3c   :  { %1532 = vmatmul.msk.bf16.vlgmr.msra.gmra.mxu1 %vm112_vm0, %v264_v10  ;;  %438 = vmatpush.bf16.msra.mxu0 %v1929_v11 }
  0x3d   :  { %1534 = vmatmul.msk.bf16.vlgmr.msra.gmra.mxu3 %vm112_vm0, %v302_v12  ;;  %465 = vmatpush.bf16.msra.mxu1 %v1933_v13 }
  0x3e   :  { %578 = vmatpush.bf16.msra.mxu2 %v1929_v11  ;;  %600 = vmatpush.bf16.msra.mxu3 %v1933_v13 }
  0x40   :  { %439 = vmatpush.bf16.msra.mxu0 %v1937_v14 }
  0x41   :  { %466 = vmatpush.bf16.msra.mxu1 %v1941_v15 }
  0x42   :  { %579 = vmatpush.bf16.msra.mxu2 %v1937_v14  ;;  %601 = vmatpush.bf16.msra.mxu3 %v1941_v15 }
  0x4b   :  { %1535 = vmatmul.msk.bf16.vlgmr.msrb.gmra.mxu0 %vm112_vm0, %v340_v16  ;;  %1537 = vmatmul.msk.bf16.vlgmr.msrb.gmra.mxu2 %vm112_vm0, %v378_v17 }
  0x4c   :  { %1536 = vmatmul.msk.bf16.vlgmr.msrb.gmra.mxu1 %vm112_vm0, %v340_v16  ;;  %712 = vmatpush.bf16.msrb.mxu0 %v1929_v11 }
  0x4d   :  { %1538 = vmatmul.msk.bf16.vlgmr.msrb.gmra.mxu3 %vm112_vm0, %v378_v17  ;;  %734 = vmatpush.bf16.msrb.mxu1 %v1933_v13 }
  0x4e   :  { %846 = vmatpush.bf16.msrb.mxu2 %v1929_v11  ;;  %868 = vmatpush.bf16.msrb.mxu3 %v1933_v13 }
  0x50   :  { %713 = vmatpush.bf16.msrb.mxu0 %v1937_v14 }
  0x51   :  { %735 = vmatpush.bf16.msrb.mxu1 %v1941_v15 }
  0x52   :  { %847 = vmatpush.bf16.msrb.mxu2 %v1937_v14  ;;  %869 = vmatpush.bf16.msrb.mxu3 %v1941_v15 }
  0x5b   :  { %440 = vmatmul.bf16.vlgmr.msra.gmra.mxu0 %v1871_v18 }
  0x5c   :  { %467 = vmatmul.bf16.vlgmr.msra.gmra.mxu1 %v1871_v18  ;;  %980 = vmatpush.bf16.msra.mxu0 %v1929_v11 }
  0x5d   :  { %1002 = vmatpush.bf16.msra.mxu1 %v1933_v13 }
  0x60   :  { %981 = vmatpush.bf16.msra.mxu0 %v1937_v14 }
  0x61   :  { %1003 = vmatpush.bf16.msra.mxu1 %v1941_v15 }
  0x98   :  { %v125_v22 = vpop.f32.mrf.mxu0 }
  0x99   :  { %v138_v23 = vpop.f32.mrf.mxu1  ;;  %v126_v25 = vadd.f32 %v125_v22, %v1970_v21 }
  0x9a   :  { %v139_v24 = vadd.f32 %v138_v23, %v1968_v20 }
  0x9c   :  { %v144_v26 = vrot.slane %v139_v24, 6 }
  0x9e   :  { %v146_v27 = vsel %vm145_vm1, %v126_v25, %v144_v26  ;;  %v163_v28 = vpop.f32.mrf.mxu2 }
  0x9f   :  { %148 = vst [vmem:[#allocation2] sm:$0xf] %v146_v27  ;;  %v164_v33 = vadd.f32 %v163_v28, %v1970_v21 }
  0xa0   :  { %v127_v29 = vpop.f32.mrf.mxu0  ;;  %v176_v30 = vpop.f32.mrf.mxu3 }
  0xa1   :  { %v140_v31 = vpop.f32.mrf.mxu1  ;;  %v177_v32 = vadd.f32 %v176_v30, %v1968_v20 }
  0xa3   :  { %v182_v34 = vrot.slane %v177_v32, 6 }
  0xa5   :  { %v183_v35 = vsel %vm145_vm1, %v164_v33, %v182_v34 }
  0xa6   :  { %186 = vst [vmem:[#allocation2 + $0x4] sm:$0xf] %v183_v35  ;;  %v165_v36 = vpop.f32.mrf.mxu2  ;;  %v415_v27 = vld [vmem:[#allocation2] sm:$0x3] }
  0xa8   :  { %v201_v37 = vpop.f32.mrf.mxu0  ;;  %v178_v38 = vpop.f32.mrf.mxu3 }
  0xa9   :  { %v214_v39 = vpop.f32.mrf.mxu1  ;;  %v202_v41 = vadd.f32 %v201_v37, %v1970_v21 }
  0xaa   :  { %v215_v40 = vadd.f32 %v214_v39, %v1968_v20 }
  0xac   :  { %v220_v42 = vrot.slane %v215_v40, 6 }
  0xae   :  { %v221_v43 = vsel %vm145_vm1, %v202_v41, %v220_v42  ;;  %v239_v44 = vpop.f32.mrf.mxu2 }
  0xaf   :  { %224 = vst [vmem:[#allocation2 + $0x8] sm:$0xf] %v221_v43  ;;  %v240_v49 = vadd.f32 %v239_v44, %v1970_v21 }
  0xb0   :  { %v203_v45 = vpop.f32.mrf.mxu0  ;;  %v252_v46 = vpop.f32.mrf.mxu3 }
  0xb1   :  { %v216_v47 = vpop.f32.mrf.mxu1  ;;  %v253_v48 = vadd.f32 %v252_v46, %v1968_v20 }
  0xb3   :  { %v258_v50 = vrot.slane %v253_v48, 6 }
  0xb5   :  { %v259_v51 = vsel %vm145_vm1, %v240_v49, %v258_v50 }
  0xb6   :  { %262 = vst [vmem:[#allocation2 + $0xc] sm:$0xf] %v259_v51  ;;  %v241_v52 = vpop.f32.mrf.mxu2 }
  0xb8   :  { %v277_v53 = vpop.f32.mrf.mxu0  ;;  %v254_v54 = vpop.f32.mrf.mxu3 }
  0xb9   :  { %v290_v55 = vpop.f32.mrf.mxu1  ;;  %v278_v57 = vadd.f32 %v277_v53, %v1970_v21 }
  0xba   :  { %v291_v56 = vadd.f32 %v290_v55, %v1968_v20 }
  0xbc   :  { %v296_v58 = vrot.slane %v291_v56, 6 }
  0xbe   :  { %v297_v59 = vsel %vm145_vm1, %v278_v57, %v296_v58  ;;  %v315_v60 = vpop.f32.mrf.mxu2 }
  0xbf   :  { %300 = vst [vmem:[#allocation2 + $0x10] sm:$0xf] %v297_v59  ;;  %v316_v1 = vadd.f32 %v315_v60, %v1970_v21 }
  0xc0   :  { %v279_v61 = vpop.f32.mrf.mxu0  ;;  %v328_v62 = vpop.f32.mrf.mxu3 }
  0xc1   :  { %v292_v63 = vpop.f32.mrf.mxu1  ;;  %v329_v0 = vadd.f32 %v328_v62, %v1968_v20 }
  0xc3   :  { %v334_v2 = vrot.slane %v329_v0, 6 }
  0xc5   :  { %v335_v3 = vsel %vm145_vm1, %v316_v1, %v334_v2 }
  0xc6   :  { %338 = vst [vmem:[#allocation2 + $0x14] sm:$0xf] %v335_v3  ;;  %v317_v4 = vpop.f32.mrf.mxu2 }
  0xc8   :  { %v353_v5 = vpop.f32.mrf.mxu0  ;;  %v330_v6 = vpop.f32.mrf.mxu3 }
  0xc9   :  { %v366_v7 = vpop.f32.mrf.mxu1  ;;  %v354_v9 = vadd.f32 %v353_v5, %v1970_v21 }
  0xca   :  { %v367_v8 = vadd.f32 %v366_v7, %v1968_v20 }
  0xcc   :  { %v372_v10 = vrot.slane %v367_v8, 6 }
  0xce   :  { %v373_v12 = vsel %vm145_vm1, %v354_v9, %v372_v10  ;;  %v391_v16 = vpop.f32.mrf.mxu2 }
  0xcf   :  { %376 = vst [vmem:[#allocation2 + $0x18] sm:$0xf] %v373_v12  ;;  %v392_v22 = vadd.f32 %v391_v16, %v1970_v21 }
  0xd0   :  { %v355_v17 = vpop.f32.mrf.mxu0  ;;  %v404_v18 = vpop.f32.mrf.mxu3 }
  0xd1   :  { %v405_v19 = vadd.f32 %v404_v18, %v1968_v20  ;;  %v368_v23 = vpop.f32.mrf.mxu1 }
  0xd3   :  { %v410_v24 = vrot.slane %v405_v19, 6 }
  0xd5   :  { %v411_v25 = vsel %vm145_vm1, %v392_v22, %v410_v24 }
  0xd6   :  { %414 = vst [vmem:[#allocation2 + $0x1c] sm:$0xf] %v411_v25  ;;  %v393_v26 = vpop.f32.mrf.mxu2  ;;  %v564_v25 = vld [vmem:[#allocation2 + $0x4] sm:$0x3] }
  0xd8   :  { %v441_v28 = vpop.f32.mrf.mxu0  ;;  %v406_v29 = vpop.f32.mrf.mxu3 }
  0xd9   :  { %v445_v30 = vadd.f32 %v441_v28, %v415_v27  ;;  %v468_v31 = vpop.f32.mrf.mxu1  ;;  %v586_v29 = vld [vmem:[#allocation2 + $0x1a] sm:$0x3] }
  0xdb   :  { %1605 = vtanh.f32 %v445_v30  ;;  %v1555_v36 = vmul.f32 -1.442695, %v445_v30 }
  0xdd   :  { %v446_v32 = vld [vmem:[#allocation2 + $0x1e] sm:$0x3] }
  0xde   :  { %v472_v33 = vadd.f32 %v468_v31, %v446_v32 }
  0xe0   :  { %v443_v34 = vpop.f32.mrf.mxu0  ;;  %1607 = vtanh.f32 %v472_v33  ;;  %v1556_v37 = vmul.f32 -1.442695, %v472_v33 }
  0xe1   :  { %v1606_v35 = vpop.eup %1605  ;;  %v470_v20 = vpop.f32.mrf.mxu1  ;;  %1609 = vpow2.f32 %v1555_v36 }
  0xe2   :  { %495 = vrot.lane.b32.xlu0 %v1606_v35, %s1868_s13  ;;  %1611 = vpow2.f32 %v1556_v37 }
  0xe6   :  { %v1608_v21 = vpop.eup %1607 }
  0xe7   :  { %v1610_v38 = vpop.eup %1609 }
  0xe8   :  { %v476_v39 = vadd.f32 1.0, %v1610_v38  ;;  %v1612_v40 = vpop.eup %1611 }
  0xe9   :  { %v513_v41 = vadd.f32 1.0, %v1612_v40 }
  0xea   :  { %532 = vrot.lane.b32.xlu0 %v1608_v21, %s1868_s13  ;;  %1613 = vrcp.f32 %v476_v39  ;;  %v488_v50 = vand.u32 2147483648, %v476_v39  ;;  %vm482_vm3 = vweird.f32 %v476_v39  ;;  %v486_v51 = vand.u32 2147483647, %v476_v39 }
  0xeb   :  { %1615 = vrcp.f32 %v513_v41  ;;  %vm519_vm6 = vweird.f32 %v513_v41  ;;  %v525_v57 = vand.u32 2147483648, %v513_v41  ;;  %v523_v60 = vand.u32 2147483647, %v513_v41 }
  0xec   :  { %v489_v54 = vor.u32 1.1754944e-38, %v488_v50  ;;  %vm487_vm5 = vcmp.eq.f32.partialorder %v486_v51, 8.507059e+37 }
  0xed   :  { %v526_v61 = vor.u32 1.1754944e-38, %v525_v57  ;;  %vm524_vm9 = vcmp.eq.f32.partialorder %v523_v60, 8.507059e+37 }
  0xf0   :  { %v1614_v42 = vpop.eup %1613 }
  0xf1   :  { %v478_v43 = vmul.f32 %v1614_v42, %v476_v39  ;;  %v1616_v45 = vpop.eup %1615  ;;  %vm483_vm2 = vweird.f32 %v1614_v42 }
  0xf2   :  { %v515_v47 = vmul.f32 %v1616_v45, %v513_v41  ;;  %vm484_vm4 = vmor %vm482_vm3, %vm483_vm2  ;;  %vm520_vm7 = vweird.f32 %v1616_v45 }
  0xf3   :  { %v479_v44 = vsub.f32 1.0, %v478_v43  ;;  %vm521_vm8 = vmor %vm519_vm6, %vm520_vm7 }
  0xf4   :  { %v516_v49 = vsub.f32 1.0, %v515_v47 }
  0xf5   :  { %v480_v46 = vmul.f32 %v1614_v42, %v479_v44 }
  0xf6   :  { %v517_v53 = vmul.f32 %v1616_v45, %v516_v49 }
  0xf7   :  { %v481_v48 = vadd.f32 %v1614_v42, %v480_v46 }
  0xf8   :  { %v518_v59 = vadd.f32 %v1616_v45, %v517_v53 }
  0xf9   :  { %v485_v52 = vsel %vm484_vm4, %v1614_v42, %v481_v48 }
  0xfa   :  { %v490_v56 = vsel %vm487_vm5, %v489_v54, %v485_v52  ;;  %v522_v62 = vsel %vm521_vm8, %v1616_v45, %v518_v59 }
  0xfb   :  { %v527_v63 = vsel %vm524_vm9, %v526_v61, %v522_v62  ;;  %v493_v2 = vmul.f32 0.0, %v490_v56 }
  0xfc   :  { %v530_v5 = vmul.f32 0.0, %v527_v63 }
 0x154   :  { %v496_v55 = vpop.permute.xlu0 %495 }
 0x155   :  { %v498_v58 = vmul.f32 %v496_v55, %v490_v56 }
 0x157   :  { %500 = vrot.lane.b32.xlu1 %v498_v58, %s1872_s4 }
 0x15c   :  { %v533_v0 = vpop.permute.xlu0 %532 }
 0x15d   :  { %v535_v1 = vmul.f32 %v533_v0, %v527_v63 }
 0x15f   :  { %537 = vrot.lane.b32.xlu1 %v535_v1, %s1872_s4 }
 0x1c9   :  { %v501_v3 = vpop.permute.xlu1 %500 }
 0x1ca   :  { %v2000_v4 = vadd.f32 %v501_v3, %v493_v2 }
 0x1cc   :  { %1617 = vtanh.f32 %v2000_v4 }
 0x1d1   :  { %v538_v6 = vpop.permute.xlu1 %537 }
 0x1d2   :  { %v1618_v7 = vpop.eup %1617  ;;  %v2003_v8 = vadd.f32 %v538_v6, %v530_v5 }
 0x1d3   :  { %506 = vrot.lane.b32.xlu2 %v1618_v7, %s1868_s13 }
 0x1d4   :  { %1619 = vtanh.f32 %v2003_v8 }
 0x1da   :  { %v1620_v9 = vpop.eup %1619 }
 0x1db   :  { %543 = vrot.lane.b32.xlu2 %v1620_v9, %s1868_s13 }
 0x22d   :  { %v507_v10 = vpop.permute.xlu2 %506 }
 0x22e   :  { %v509_v12 = vmul.f32 %v507_v10, %v490_v56 }
 0x230   :  { %548 = vst [vmem:[#allocation1] ss:$4 sm:$0xff] %v509_v12  ;;  %v565_v16 = vpack.c.bf16 %v509_v12, %v509_v12 }
 0x232   :  { %567 = vrot.lane.b32.xlu0 %v565_v16, %s1872_s4 }
 0x235   :  { %v544_v17 = vpop.permute.xlu2 %543 }
 0x236   :  { %v546_v18 = vmul.f32 %v544_v17, %v527_v63 }
 0x237   :  { %v2009_v19 = vld.sshfl [vmem:[#allocation1] sm:$0xff pattern:$0x73625140] }
 0x238   :  { %556 = vst [vmem:[#allocation1] ss:$4 sm:$0xff] %v546_v18  ;;  %v587_v22 = vpack.c.bf16 %v546_v18, %v546_v18 }
 0x23a   :  { %589 = vrot.lane.b32.xlu1 %v587_v22, %s1872_s4 }
 0x23f   :  { %v2032_v10 = vld.sshfl [vmem:[#allocation1] sm:$0xff pattern:$0x73625140] }
 0x2a4   :  { %v568_v23 = vpop.permute.xlu0 %567 }
 0x2a5   :  { %1557 = vmatmul.msk.bf16.vlgmr.msra.gmra.mxu2 %vm428_vm10, %v568_v23 }
 0x2a6   :  { %1112 = vmatpush.bf16.msra.mxu2 %v1929_v11 }
 0x2aa   :  { %1113 = vmatpush.bf16.msra.mxu2 %v1937_v14 }
 0x2ac   :  { %v590_v24 = vpop.permute.xlu1 %589 }
 0x2ad   :  { %1558 = vmatmul.msk.bf16.vlgmr.msra.gmra.mxu3 %vm428_vm10, %v590_v24  ;;  %v698_v24 = vld [vmem:[#allocation2 + $0x8] sm:$0x3] }
 0x2ae   :  { %1134 = vmatpush.bf16.msra.mxu3 %v1933_v13 }
 0x2b2   :  { %1135 = vmatpush.bf16.msra.mxu3 %v1941_v15 }
 0x328   :  { %v581_v26 = vpop.f32.mrf.mxu2 }
 0x329   :  { %v585_v27 = vadd.f32 %v581_v26, %v564_v25 }
 0x32b   :  { %1621 = vtanh.f32 %v585_v27  ;;  %v1559_v35 = vmul.f32 -1.442695, %v585_v27 }
 0x330   :  { %v583_v28 = vpop.f32.mrf.mxu2  ;;  %v603_v30 = vpop.f32.mrf.mxu3 }
 0x331   :  { %v1622_v31 = vpop.eup %1621  ;;  %v607_v32 = vadd.f32 %v603_v30, %v586_v29  ;;  %v720_v29 = vld [vmem:[#allocation2 + $0x16] sm:$0x3] }
 0x332   :  { %630 = vrot.lane.b32.xlu2 %v1622_v31, %s1868_s13 }
 0x333   :  { %1623 = vtanh.f32 %v607_v32  ;;  %v1560_v39 = vmul.f32 -1.442695, %v607_v32 }
 0x334   :  { %1625 = vpow2.f32 %v1559_v35 }
 0x338   :  { %v605_v33 = vpop.f32.mrf.mxu3 }
 0x339   :  { %v1624_v34 = vpop.eup %1623 }
 0x33a   :  { %667 = vrot.lane.b32.xlu0 %v1624_v34, %s1868_s13  ;;  %v1626_v20 = vpop.eup %1625 }
 0x33b   :  { %v611_v21 = vadd.f32 1.0, %v1626_v20 }
 0x33d   :  { %1627 = vrcp.f32 %v611_v21  ;;  %v623_v42 = vand.u32 2147483648, %v611_v21  ;;  %vm617_vm12 = vweird.f32 %v611_v21  ;;  %v621_v43 = vand.u32 2147483647, %v611_v21 }
 0x33e   :  { %1629 = vpow2.f32 %v1560_v39 }
 0x33f   :  { %v624_v46 = vor.u32 1.1754944e-38, %v623_v42  ;;  %vm622_vm14 = vcmp.eq.f32.partialorder %v621_v43, 8.507059e+37 }
 0x343   :  { %v1628_v36 = vpop.eup %1627 }
 0x344   :  { %v613_v37 = vmul.f32 %v1628_v36, %v611_v21  ;;  %vm618_vm11 = vweird.f32 %v1628_v36  ;;  %v1630_v44 = vpop.eup %1629 }
 0x345   :  { %vm619_vm13 = vmor %vm617_vm12, %vm618_vm11  ;;  %v648_v47 = vadd.f32 1.0, %v1630_v44 }
 0x346   :  { %v614_v38 = vsub.f32 1.0, %v613_v37 }
 0x347   :  { %1631 = vrcp.f32 %v648_v47  ;;  %v660_v56 = vand.u32 2147483648, %v648_v47  ;;  %vm654_vm0 = vweird.f32 %v648_v47  ;;  %v658_v57 = vand.u32 2147483647, %v648_v47 }
 0x348   :  { %v615_v40 = vmul.f32 %v1628_v36, %v614_v38 }
 0x349   :  { %v661_v59 = vor.u32 1.1754944e-38, %v660_v56  ;;  %vm659_vm2 = vcmp.eq.f32.partialorder %v658_v57, 8.507059e+37 }
 0x34a   :  { %v616_v41 = vadd.f32 %v1628_v36, %v615_v40 }
 0x34c   :  { %v620_v45 = vsel %vm619_vm13, %v1628_v36, %v616_v41 }
 0x34d   :  { %v625_v48 = vsel %vm622_vm14, %v624_v46, %v620_v45  ;;  %v1632_v51 = vpop.eup %1631 }
 0x34e   :  { %v650_v52 = vmul.f32 %v1632_v51, %v648_v47  ;;  %vm655_vm15 = vweird.f32 %v1632_v51  ;;  %v628_v63 = vmul.f32 %v625_v48, %v2000_v4 }
 0x34f   :  { %vm656_vm1 = vmor %vm654_vm0, %vm655_vm15 }
 0x350   :  { %v651_v53 = vsub.f32 1.0, %v650_v52 }
 0x352   :  { %v652_v54 = vmul.f32 %v1632_v51, %v651_v53 }
 0x354   :  { %v653_v55 = vadd.f32 %v1632_v51, %v652_v54 }
 0x356   :  { %v657_v58 = vsel %vm656_vm1, %v1632_v51, %v653_v55 }
 0x357   :  { %v662_v61 = vsel %vm659_vm2, %v661_v59, %v657_v58 }
 0x358   :  { %v665_v2 = vmul.f32 %v662_v61, %v2003_v8 }
 0x38c   :  { %v631_v49 = vpop.permute.xlu2 %630 }
 0x38d   :  { %v633_v50 = vmul.f32 %v631_v49, %v625_v48 }
 0x38f   :  { %635 = vrot.lane.b32.xlu1 %v633_v50, %s1872_s4 }
 0x3ac   :  { %v668_v60 = vpop.permute.xlu0 %667 }
 0x3ad   :  { %v670_v62 = vmul.f32 %v668_v60, %v662_v61 }
 0x3af   :  { %672 = vrot.lane.b32.xlu2 %v670_v62, %s1872_s4 }
 0x401   :  { %v636_v0 = vpop.permute.xlu1 %635 }
 0x402   :  { %v2023_v1 = vadd.f32 %v636_v0, %v628_v63 }
 0x404   :  { %1633 = vtanh.f32 %v2023_v1 }
 0x409   :  { %v673_v3 = vpop.permute.xlu2 %672 }
 0x40a   :  { %v1634_v5 = vpop.eup %1633  ;;  %v2027_v6 = vadd.f32 %v673_v3, %v665_v2 }
 0x40b   :  { %641 = vrot.lane.b32.xlu0 %v1634_v5, %s1868_s13 }
 0x40c   :  { %1635 = vtanh.f32 %v2027_v6 }
 0x412   :  { %v1636_v7 = vpop.eup %1635 }
 0x413   :  { %678 = vrot.lane.b32.xlu1 %v1636_v7, %s1868_s13 }
 0x47d   :  { %v642_v9 = vpop.permute.xlu0 %641 }
 0x47e   :  { %v644_v4 = vmul.f32 %v642_v9, %v625_v48 }
 0x480   :  { %683 = vst [vmem:[#allocation1] ss:$4 sm:$0xff] %v644_v4  ;;  %v699_v12 = vpack.c.bf16 %v644_v4, %v644_v4 }
 0x482   :  { %701 = vrot.lane.b32.xlu2 %v699_v12, %s1872_s4 }
 0x485   :  { %v679_v8 = vpop.permute.xlu1 %678 }
 0x486   :  { %v681_v16 = vmul.f32 %v679_v8, %v662_v61 }
 0x487   :  { %v2035_v17 = vld.sshfl [vmem:[#allocation1] sm:$0xff pattern:$0x73625140] }
 0x488   :  { %691 = vst [vmem:[#allocation1] ss:$4 sm:$0xff] %v681_v16  ;;  %v721_v18 = vpack.c.bf16 %v681_v16, %v681_v16 }
 0x48a   :  { %723 = vrot.lane.b32.xlu0 %v721_v18, %s1872_s4 }
 0x48f   :  { %v2058_v12 = vld.sshfl [vmem:[#allocation1] sm:$0xff pattern:$0x73625140] }
 0x4dc   :  { %v702_v22 = vpop.permute.xlu2 %701 }
 0x4dd   :  { %1561 = vmatmul.msk.bf16.vlgmr.msrb.gmra.mxu0 %vm428_vm10, %v702_v22 }
 0x4de   :  { %1244 = vmatpush.bf16.msrb.mxu0 %v1929_v11 }
 0x4e2   :  { %1245 = vmatpush.bf16.msrb.mxu0 %v1937_v14 }
 0x4fc   :  { %v724_v23 = vpop.permute.xlu0 %723 }
 0x4fd   :  { %1562 = vmatmul.msk.bf16.vlgmr.msrb.gmra.mxu1 %vm428_vm10, %v724_v23 }
 0x4fe   :  { %1266 = vmatpush.bf16.msrb.mxu1 %v1933_v13 }
 0x502   :  { %1267 = vmatpush.bf16.msrb.mxu1 %v1941_v15 }
 0x55a   :  { %v715_v25 = vpop.f32.mrf.mxu0 }
 0x55b   :  { %v719_v26 = vadd.f32 %v715_v25, %v698_v24  ;;  %v832_v25 = vld [vmem:[#allocation2 + $0xc] sm:$0x3] }
 0x55d   :  { %1637 = vtanh.f32 %v719_v26  ;;  %v1563_v34 = vmul.f32 -1.442695, %v719_v26 }
 0x562   :  { %v717_v27 = vpop.f32.mrf.mxu0 }
 0x563   :  { %v1638_v28 = vpop.eup %1637 }
 0x564   :  { %764 = vrot.lane.b32.xlu1 %v1638_v28, %s1868_s13 }
 0x57a   :  { %v737_v30 = vpop.f32.mrf.mxu1 }
 0x57b   :  { %v741_v31 = vadd.f32 %v737_v30, %v720_v29  ;;  %v854_v29 = vld [vmem:[#allocation2 + $0x12] sm:$0x3] }
 0x57d   :  { %1639 = vtanh.f32 %v741_v31  ;;  %v1564_v35 = vmul.f32 -1.442695, %v741_v31 }
 0x57e   :  { %1641 = vpow2.f32 %v1563_v34 }
 0x57f   :  { %1643 = vpow2.f32 %v1564_v35 }
 0x582   :  { %v739_v32 = vpop.f32.mrf.mxu1 }
 0x583   :  { %v1640_v33 = vpop.eup %1639 }
 0x584   :  { %801 = vrot.lane.b32.xlu2 %v1640_v33, %s1868_s13  ;;  %v1642_v20 = vpop.eup %1641 }
 0x585   :  { %v745_v21 = vadd.f32 1.0, %v1642_v20  ;;  %v1644_v36 = vpop.eup %1643 }
 0x586   :  { %v782_v37 = vadd.f32 1.0, %v1644_v36 }
 0x587   :  { %1645 = vrcp.f32 %v745_v21  ;;  %v757_v46 = vand.u32 2147483648, %v745_v21  ;;  %vm751_vm4 = vweird.f32 %v745_v21  ;;  %v755_v47 = vand.u32 2147483647, %v745_v21 }
 0x588   :  { %1647 = vrcp.f32 %v782_v37  ;;  %v794_v55 = vand.u32 2147483648, %v782_v37  ;;  %vm788_vm8 = vweird.f32 %v782_v37  ;;  %v792_v56 = vand.u32 2147483647, %v782_v37 }
 0x589   :  { %v758_v50 = vor.u32 1.1754944e-38, %v757_v46  ;;  %vm756_vm6 = vcmp.eq.f32.partialorder %v755_v47, 8.507059e+37 }
 0x58a   :  { %v795_v58 = vor.u32 1.1754944e-38, %v794_v55  ;;  %vm793_vm11 = vcmp.eq.f32.partialorder %v792_v56, 8.507059e+37 }
 0x58d   :  { %v1646_v38 = vpop.eup %1645 }
 0x58e   :  { %v747_v39 = vmul.f32 %v1646_v38, %v745_v21  ;;  %v1648_v41 = vpop.eup %1647  ;;  %vm752_vm3 = vweird.f32 %v1646_v38 }
 0x58f   :  { %v784_v43 = vmul.f32 %v1648_v41, %v782_v37  ;;  %vm753_vm5 = vmor %vm751_vm4, %vm752_vm3  ;;  %vm789_vm7 = vweird.f32 %v1648_v41 }
 0x590   :  { %v748_v40 = vsub.f32 1.0, %v747_v39  ;;  %vm790_vm9 = vmor %vm788_vm8, %vm789_vm7 }
 0x591   :  { %v785_v45 = vsub.f32 1.0, %v784_v43 }
 0x592   :  { %v749_v42 = vmul.f32 %v1646_v38, %v748_v40 }
 0x593   :  { %v786_v49 = vmul.f32 %v1648_v41, %v785_v45 }
 0x594   :  { %v750_v44 = vadd.f32 %v1646_v38, %v749_v42 }
 0x595   :  { %v787_v54 = vadd.f32 %v1648_v41, %v786_v49 }
 0x596   :  { %v754_v48 = vsel %vm753_vm5, %v1646_v38, %v750_v44 }
 0x597   :  { %v759_v52 = vsel %vm756_vm6, %v758_v50, %v754_v48  ;;  %v791_v57 = vsel %vm790_vm9, %v1648_v41, %v787_v54 }
 0x598   :  { %v796_v59 = vsel %vm793_vm11, %v795_v58, %v791_v57  ;;  %v762_v62 = vmul.f32 %v759_v52, %v2023_v1 }
 0x599   :  { %v799_v2 = vmul.f32 %v796_v59, %v2027_v6 }
 0x5d6   :  { %v765_v51 = vpop.permute.xlu1 %764 }
 0x5d7   :  { %v767_v53 = vmul.f32 %v765_v51, %v759_v52 }
 0x5d9   :  { %769 = vrot.lane.b32.xlu0 %v767_v53, %s1872_s4 }
 0x5de   :  { %v802_v60 = vpop.permute.xlu2 %801 }
 0x5df   :  { %v804_v61 = vmul.f32 %v802_v60, %v796_v59 }
 0x5e1   :  { %806 = vrot.lane.b32.xlu1 %v804_v61, %s1872_s4 }
 0x64b   :  { %v770_v63 = vpop.permute.xlu0 %769 }
 0x64c   :  { %v2049_v0 = vadd.f32 %v770_v63, %v762_v62 }
 0x64e   :  { %1649 = vtanh.f32 %v2049_v0 }
 0x653   :  { %v807_v3 = vpop.permute.xlu1 %806 }
 0x654   :  { %v1650_v5 = vpop.eup %1649  ;;  %v2053_v7 = vadd.f32 %v807_v3, %v799_v2 }
 0x655   :  { %775 = vrot.lane.b32.xlu2 %v1650_v5, %s1868_s13 }
 0x656   :  { %1651 = vtanh.f32 %v2053_v7 }
 0x65c   :  { %v1652_v9 = vpop.eup %1651 }
 0x65d   :  { %812 = vrot.lane.b32.xlu0 %v1652_v9, %s1868_s13 }
 0x6af   :  { %v776_v4 = vpop.permute.xlu2 %775 }
 0x6b0   :  { %v778_v1 = vmul.f32 %v776_v4, %v759_v52 }
 0x6b2   :  { %817 = vst [vmem:[#allocation1] ss:$4 sm:$0xff] %v778_v1  ;;  %v833_v8 = vpack.c.bf16 %v778_v1, %v778_v1 }
 0x6b4   :  { %835 = vrot.lane.b32.xlu1 %v833_v8, %s1872_s4 }
 0x6b9   :  { %v2061_v18 = vld.sshfl [vmem:[#allocation1] sm:$0xff pattern:$0x73625140] }
 0x6cf   :  { %v813_v6 = vpop.permute.xlu0 %812 }
 0x6d0   :  { %v815_v16 = vmul.f32 %v813_v6, %v796_v59 }
 0x6d2   :  { %825 = vst [vmem:[#allocation1] ss:$4 sm:$0xff] %v815_v16  ;;  %v855_v22 = vpack.c.bf16 %v815_v16, %v815_v16 }
 0x6d4   :  { %857 = vrot.lane.b32.xlu2 %v855_v22, %s1872_s4 }
 0x6d9   :  { %v2084_v4 = vld.sshfl [vmem:[#allocation1] sm:$0xff pattern:$0x73625140] }
 0x726   :  { %v836_v23 = vpop.permute.xlu1 %835 }
 0x727   :  { %1565 = vmatmul.msk.bf16.vlgmr.msrb.gmra.mxu2 %vm428_vm10, %v836_v23 }
 0x728   :  { %1376 = vmatpush.bf16.msrb.mxu2 %v1929_v11 }
 0x72c   :  { %1377 = vmatpush.bf16.msrb.mxu2 %v1937_v14 }
 0x72e   :  { %v858_v24 = vpop.permute.xlu2 %857 }
 0x72f   :  { %1566 = vmatmul.msk.bf16.vlgmr.msrb.gmra.mxu3 %vm428_vm10, %v858_v24  ;;  %v966_v24 = vld [vmem:[#allocation2 + $0x10] sm:$0x3] }
 0x730   :  { %1398 = vmatpush.bf16.msrb.mxu3 %v1933_v13 }
 0x734   :  { %1399 = vmatpush.bf16.msrb.mxu3 %v1941_v15 }
 0x7aa   :  { %v849_v26 = vpop.f32.mrf.mxu2 }
 0x7ab   :  { %v853_v27 = vadd.f32 %v849_v26, %v832_v25 }
 0x7ad   :  { %1653 = vtanh.f32 %v853_v27  ;;  %v1567_v33 = vmul.f32 -1.442695, %v853_v27 }
 0x7b2   :  { %v851_v28 = vpop.f32.mrf.mxu2  ;;  %v871_v30 = vpop.f32.mrf.mxu3 }
 0x7b3   :  { %v1654_v31 = vpop.eup %1653  ;;  %v875_v32 = vadd.f32 %v871_v30, %v854_v29  ;;  %v988_v28 = vld [vmem:[#allocation2 + $0xe] sm:$0x3] }
 0x7b4   :  { %898 = vrot.lane.b32.xlu0 %v1654_v31, %s1868_s13 }
 0x7b5   :  { %1655 = vtanh.f32 %v875_v32  ;;  %v1568_v13 = vmul.f32 -1.442695, %v875_v32 }
 0x7b6   :  { %1657 = vpow2.f32 %v1567_v33 }
 0x7b7   :  { %1659 = vpow2.f32 %v1568_v13 }
 0x7ba   :  { %v873_v11 = vpop.f32.mrf.mxu3 }
 0x7bb   :  { %v1656_v14 = vpop.eup %1655 }
 0x7bc   :  { %935 = vrot.lane.b32.xlu1 %v1656_v14, %s1868_s13  ;;  %v1658_v15 = vpop.eup %1657 }
 0x7bd   :  { %v879_v34 = vadd.f32 1.0, %v1658_v15  ;;  %v1660_v35 = vpop.eup %1659 }
 0x7be   :  { %v916_v20 = vadd.f32 1.0, %v1660_v35 }
 0x7bf   :  { %1661 = vrcp.f32 %v879_v34  ;;  %v891_v43 = vand.u32 2147483648, %v879_v34  ;;  %vm885_vm13 = vweird.f32 %v879_v34  ;;  %v889_v44 = vand.u32 2147483647, %v879_v34 }
 0x7c0   :  { %1663 = vrcp.f32 %v916_v20  ;;  %v928_v52 = vand.u32 2147483648, %v916_v20  ;;  %vm922_vm1 = vweird.f32 %v916_v20  ;;  %v926_v53 = vand.u32 2147483647, %v916_v20 }
 0x7c1   :  { %v892_v47 = vor.u32 1.1754944e-38, %v891_v43  ;;  %vm890_vm15 = vcmp.eq.f32.partialorder %v889_v44, 8.507059e+37 }
 0x7c2   :  { %v929_v55 = vor.u32 1.1754944e-38, %v928_v52  ;;  %vm927_vm3 = vcmp.eq.f32.partialorder %v926_v53, 8.507059e+37 }
 0x7c5   :  { %v1662_v21 = vpop.eup %1661 }
 0x7c6   :  { %v881_v36 = vmul.f32 %v1662_v21, %v879_v34  ;;  %v1664_v38 = vpop.eup %1663  ;;  %vm886_vm12 = vweird.f32 %v1662_v21 }
 0x7c7   :  { %v918_v40 = vmul.f32 %v1664_v38, %v916_v20  ;;  %vm887_vm14 = vmor %vm885_vm13, %vm886_vm12  ;;  %vm923_vm0 = vweird.f32 %v1664_v38 }
 0x7c8   :  { %v882_v37 = vsub.f32 1.0, %v881_v36  ;;  %vm924_vm2 = vmor %vm922_vm1, %vm923_vm0 }
 0x7c9   :  { %v919_v42 = vsub.f32 1.0, %v918_v40 }
 0x7ca   :  { %v883_v39 = vmul.f32 %v1662_v21, %v882_v37 }
 0x7cb   :  { %v920_v46 = vmul.f32 %v1664_v38, %v919_v42 }
 0x7cc   :  { %v884_v41 = vadd.f32 %v1662_v21, %v883_v39 }
 0x7cd   :  { %v921_v51 = vadd.f32 %v1664_v38, %v920_v46 }
 0x7ce   :  { %v888_v45 = vsel %vm887_vm14, %v1662_v21, %v884_v41 }
 0x7cf   :  { %v893_v49 = vsel %vm890_vm15, %v892_v47, %v888_v45  ;;  %v925_v54 = vsel %vm924_vm2, %v1664_v38, %v921_v51 }
 0x7d0   :  { %v930_v57 = vsel %vm927_vm3, %v929_v55, %v925_v54  ;;  %v896_v59 = vmul.f32 %v893_v49, %v2049_v0 }
 0x7d1   :  { %v933_v63 = vmul.f32 %v930_v57, %v2053_v7 }
 0x826   :  { %v899_v48 = vpop.permute.xlu0 %898 }
 0x827   :  { %v901_v50 = vmul.f32 %v899_v48, %v893_v49 }
 0x829   :  { %903 = vrot.lane.b32.xlu2 %v901_v50, %s1872_s4 }
 0x82e   :  { %v936_v56 = vpop.permute.xlu1 %935 }
 0x82f   :  { %v938_v58 = vmul.f32 %v936_v56, %v930_v57 }
 0x831   :  { %940 = vrot.lane.b32.xlu0 %v938_v58, %s1872_s4 }
 0x883   :  { %v904_v60 = vpop.permute.xlu2 %903 }
 0x884   :  { %v2075_v61 = vadd.f32 %v904_v60, %v896_v59 }
 0x886   :  { %1665 = vtanh.f32 %v2075_v61 }
 0x88c   :  { %v1666_v62 = vpop.eup %1665 }
 0x88d   :  { %909 = vrot.lane.b32.xlu1 %v1666_v62, %s1868_s13 }
 0x8a3   :  { %v941_v2 = vpop.permute.xlu0 %940 }
 0x8a4   :  { %v2080_v3 = vadd.f32 %v941_v2, %v933_v63 }
 0x8a6   :  { %1667 = vtanh.f32 %v2080_v3 }
 0x8ac   :  { %v1668_v5 = vpop.eup %1667 }
 0x8ad   :  { %946 = vrot.lane.b32.xlu2 %v1668_v5, %s1868_s13 }
 0x8ff   :  { %v910_v9 = vpop.permute.xlu1 %909 }
 0x900   :  { %v912_v0 = vmul.f32 %v910_v9, %v893_v49 }
 0x902   :  { %951 = vst [vmem:[#allocation1] ss:$4 sm:$0xff] %v912_v0  ;;  %v967_v1 = vpack.c.bf16 %v912_v0, %v912_v0 }
 0x904   :  { %969 = vrot.lane.b32.xlu0 %v967_v1, %s1872_s4 }
 0x907   :  { %v947_v8 = vpop.permute.xlu2 %946 }
 0x908   :  { %v949_v6 = vmul.f32 %v947_v8, %v930_v57 }
 0x909   :  { %v2087_v16 = vld.sshfl [vmem:[#allocation1] sm:$0xff pattern:$0x73625140] }
 0x90a   :  { %v989_v7 = vpack.c.bf16 %v949_v6, %v949_v6  ;;  %959 = vst [vmem:[#allocation1] ss:$4 sm:$0xff] %v949_v6 }
 0x90c   :  { %991 = vrot.lane.b32.xlu1 %v989_v7, %s1872_s4 }
 0x911   :  { %v2106_v1 = vld.sshfl [vmem:[#allocation1] sm:$0xff pattern:$0x73625140] }
 0x976   :  { %v970_v22 = vpop.permute.xlu0 %969 }
 0x977   :  { %1569 = vmatmul.msk.bf16.vlgmr.msra.gmra.mxu0 %vm428_vm10, %v970_v22 }
 0x97e   :  { %v992_v23 = vpop.permute.xlu1 %991 }
 0x97f   :  { %1570 = vmatmul.msk.bf16.vlgmr.msra.gmra.mxu1 %vm428_vm10, %v992_v23 }
 0x9f4   :  { %v983_v25 = vpop.f32.mrf.mxu0 }
 0x9f5   :  { %v987_v26 = vadd.f32 %v983_v25, %v966_v24  ;;  %v1098_v25 = vld [vmem:[#allocation2 + $0x14] sm:$0x3] }
 0x9f7   :  { %1669 = vtanh.f32 %v987_v26  ;;  %v1571_v14 = vmul.f32 -1.442695, %v987_v26 }
 0x9fc   :  { %v985_v27 = vpop.f32.mrf.mxu0  ;;  %v1005_v29 = vpop.f32.mrf.mxu1 }
 0x9fd   :  { %v1670_v30 = vpop.eup %1669  ;;  %v1009_v31 = vadd.f32 %v1005_v29, %v988_v28 }
 0x9fe   :  { %1032 = vrot.lane.b32.xlu2 %v1670_v30, %s1868_s13  ;;  %v1120_v30 = vld [vmem:[#allocation2 + $0xa] sm:$0x3] }
 0x9ff   :  { %1671 = vtanh.f32 %v1009_v31  ;;  %v1572_v20 = vmul.f32 -1.442695, %v1009_v31 }
 0xa00   :  { %1673 = vpow2.f32 %v1571_v14 }
 0xa04   :  { %v1007_v32 = vpop.f32.mrf.mxu1 }
 0xa05   :  { %v1672_v11 = vpop.eup %1671 }
 0xa06   :  { %1069 = vrot.lane.b32.xlu0 %v1672_v11, %s1868_s13  ;;  %v1674_v33 = vpop.eup %1673 }
 0xa07   :  { %v1013_v13 = vadd.f32 1.0, %v1674_v33 }
 0xa09   :  { %1675 = vrcp.f32 %v1013_v13  ;;  %v1025_v37 = vand.u32 2147483648, %v1013_v13  ;;  %vm1019_vm5 = vweird.f32 %v1013_v13  ;;  %v1023_v38 = vand.u32 2147483647, %v1013_v13 }
 0xa0a   :  { %1677 = vpow2.f32 %v1572_v20 }
 0xa0b   :  { %v1026_v41 = vor.u32 1.1754944e-38, %v1025_v37  ;;  %vm1024_vm7 = vcmp.eq.f32.partialorder %v1023_v38, 8.507059e+37 }
 0xa0f   :  { %v1676_v15 = vpop.eup %1675 }
 0xa10   :  { %v1015_v34 = vmul.f32 %v1676_v15, %v1013_v13  ;;  %vm1020_vm4 = vweird.f32 %v1676_v15  ;;  %v1678_v39 = vpop.eup %1677 }
 0xa11   :  { %vm1021_vm6 = vmor %vm1019_vm5, %vm1020_vm4  ;;  %v1050_v42 = vadd.f32 1.0, %v1678_v39 }
 0xa12   :  { %v1016_v35 = vsub.f32 1.0, %v1015_v34 }
 0xa13   :  { %1679 = vrcp.f32 %v1050_v42  ;;  %v1062_v51 = vand.u32 2147483648, %v1050_v42  ;;  %vm1056_vm9 = vweird.f32 %v1050_v42  ;;  %v1060_v52 = vand.u32 2147483647, %v1050_v42 }
 0xa14   :  { %v1017_v21 = vmul.f32 %v1676_v15, %v1016_v35 }
 0xa15   :  { %v1063_v54 = vor.u32 1.1754944e-38, %v1062_v51  ;;  %vm1061_vm12 = vcmp.eq.f32.partialorder %v1060_v52, 8.507059e+37 }
 0xa16   :  { %v1018_v36 = vadd.f32 %v1676_v15, %v1017_v21 }
 0xa18   :  { %v1022_v40 = vsel %vm1021_vm6, %v1676_v15, %v1018_v36 }
 0xa19   :  { %v1027_v43 = vsel %vm1024_vm7, %v1026_v41, %v1022_v40  ;;  %v1680_v46 = vpop.eup %1679 }
 0xa1a   :  { %v1052_v47 = vmul.f32 %v1680_v46, %v1050_v42  ;;  %vm1057_vm8 = vweird.f32 %v1680_v46  ;;  %v1030_v58 = vmul.f32 %v1027_v43, %v2075_v61 }
 0xa1b   :  { %vm1058_vm11 = vmor %vm1056_vm9, %vm1057_vm8 }
 0xa1c   :  { %v1053_v48 = vsub.f32 1.0, %v1052_v47 }
 0xa1e   :  { %v1054_v49 = vmul.f32 %v1680_v46, %v1053_v48 }
 0xa20   :  { %v1055_v50 = vadd.f32 %v1680_v46, %v1054_v49 }
 0xa22   :  { %v1059_v53 = vsel %vm1058_vm11, %v1680_v46, %v1055_v50 }
 0xa23   :  { %v1064_v56 = vsel %vm1061_vm12, %v1063_v54, %v1059_v53 }
 0xa24   :  { %v1067_v62 = vmul.f32 %v1064_v56, %v2080_v3 }
 0xa58   :  { %v1033_v44 = vpop.permute.xlu2 %1032 }
 0xa59   :  { %v1035_v45 = vmul.f32 %v1033_v44, %v1027_v43 }
 0xa5b   :  { %1037 = vrot.lane.b32.xlu1 %v1035_v45, %s1872_s4 }
 0xa78   :  { %v1070_v55 = vpop.permute.xlu0 %1069 }
 0xa79   :  { %v1072_v57 = vmul.f32 %v1070_v55, %v1064_v56 }
 0xa7b   :  { %1074 = vrot.lane.b32.xlu2 %v1072_v57, %s1872_s4 }
 0xacd   :  { %v1038_v59 = vpop.permute.xlu1 %1037 }
 0xace   :  { %v2097_v60 = vadd.f32 %v1038_v59, %v1030_v58 }
 0xad0   :  { %1681 = vtanh.f32 %v2097_v60 }
 0xad5   :  { %v1075_v63 = vpop.permute.xlu2 %1074 }
 0xad6   :  { %v1682_v2 = vpop.eup %1681  ;;  %v2101_v5 = vadd.f32 %v1075_v63, %v1067_v62 }
 0xad7   :  { %1043 = vrot.lane.b32.xlu0 %v1682_v2, %s1868_s13 }
 0xad8   :  { %1683 = vtanh.f32 %v2101_v5 }
 0xade   :  { %v1684_v9 = vpop.eup %1683 }
 0xadf   :  { %1080 = vrot.lane.b32.xlu1 %v1684_v9, %s1868_s13 }
 0xb49   :  { %v1044_v0 = vpop.permute.xlu0 %1043 }
 0xb4a   :  { %v1046_v61 = vmul.f32 %v1044_v0, %v1027_v43 }
 0xb4c   :  { %v1099_v8 = vpack.c.bf16 %v1046_v61, %v1046_v61  ;;  %1085 = vst [vmem:[#allocation1] ss:$4 sm:$0xff] %v1046_v61 }
 0xb4e   :  { %1101 = vrot.lane.b32.xlu2 %v1099_v8, %s1872_s4 }
 0xb51   :  { %v1081_v3 = vpop.permute.xlu1 %1080 }
 0xb52   :  { %v1083_v6 = vmul.f32 %v1081_v3, %v1064_v56 }
 0xb53   :  { %v2109_v7 = vld.sshfl [vmem:[#allocation1] sm:$0xff pattern:$0x73625140] }
 0xb54   :  { %v1121_v22 = vpack.c.bf16 %v1083_v6, %v1083_v6  ;;  %1092 = vst [vmem:[#allocation1] ss:$4 sm:$0xff] %v1083_v6 }
 0xb56   :  { %1123 = vrot.lane.b32.xlu0 %v1121_v22, %s1872_s4 }
 0xb5b   :  { %v2128_v6 = vld.sshfl [vmem:[#allocation1] sm:$0xff pattern:$0x73625140] }
 0xba8   :  { %v1102_v23 = vpop.permute.xlu2 %1101 }
 0xba9   :  { %1573 = vmatmul.msk.bf16.vlgmr.msra.gmra.mxu2 %vm428_vm10, %v1102_v23 }
 0xbc8   :  { %v1124_v24 = vpop.permute.xlu0 %1123 }
 0xbc9   :  { %1574 = vmatmul.msk.bf16.vlgmr.msra.gmra.mxu3 %vm428_vm10, %v1124_v24 }
 0xc2c   :  { %v1115_v26 = vpop.f32.mrf.mxu2 }
 0xc2d   :  { %v1119_v27 = vadd.f32 %v1115_v26, %v1098_v25 }
 0xc2f   :  { %1685 = vtanh.f32 %v1119_v27  ;;  %v1575_v33 = vmul.f32 -1.442695, %v1119_v27 }
 0xc34   :  { %v1117_v28 = vpop.f32.mrf.mxu2 }
 0xc35   :  { %v1686_v29 = vpop.eup %1685  ;;  %v1230_v28 = vld [vmem:[#allocation2 + $0x18] sm:$0x3] }
 0xc36   :  { %1164 = vrot.lane.b32.xlu1 %v1686_v29, %s1868_s13 }
 0xc4c   :  { %v1137_v31 = vpop.f32.mrf.mxu3 }
 0xc4d   :  { %v1141_v32 = vadd.f32 %v1137_v31, %v1120_v30 }
 0xc4f   :  { %1687 = vtanh.f32 %v1141_v32  ;;  %v1576_v13 = vmul.f32 -1.442695, %v1141_v32  ;;  %v1252_v32 = vld [vmem:[#allocation2 + $0x6] sm:$0x3] }
 0xc50   :  { %1689 = vpow2.f32 %v1575_v33 }
 0xc51   :  { %1691 = vpow2.f32 %v1576_v13 }
 0xc54   :  { %v1139_v11 = vpop.f32.mrf.mxu3 }
 0xc55   :  { %v1688_v14 = vpop.eup %1687 }
 0xc56   :  { %1201 = vrot.lane.b32.xlu2 %v1688_v14, %s1868_s13  ;;  %v1690_v15 = vpop.eup %1689 }
 0xc57   :  { %v1145_v34 = vadd.f32 1.0, %v1690_v15  ;;  %v1692_v35 = vpop.eup %1691 }
 0xc58   :  { %v1182_v20 = vadd.f32 1.0, %v1692_v35 }
 0xc59   :  { %1693 = vrcp.f32 %v1145_v34  ;;  %v1157_v43 = vand.u32 2147483648, %v1145_v34  ;;  %vm1151_vm14 = vweird.f32 %v1145_v34  ;;  %v1155_v44 = vand.u32 2147483647, %v1145_v34 }
 0xc5a   :  { %1695 = vrcp.f32 %v1182_v20  ;;  %v1194_v52 = vand.u32 2147483648, %v1182_v20  ;;  %vm1188_vm2 = vweird.f32 %v1182_v20  ;;  %v1192_v53 = vand.u32 2147483647, %v1182_v20 }
 0xc5b   :  { %v1158_v47 = vor.u32 1.1754944e-38, %v1157_v43  ;;  %vm1156_vm0 = vcmp.eq.f32.partialorder %v1155_v44, 8.507059e+37 }
 0xc5c   :  { %v1195_v55 = vor.u32 1.1754944e-38, %v1194_v52  ;;  %vm1193_vm4 = vcmp.eq.f32.partialorder %v1192_v53, 8.507059e+37 }
 0xc5f   :  { %v1694_v21 = vpop.eup %1693 }
 0xc60   :  { %v1147_v36 = vmul.f32 %v1694_v21, %v1145_v34  ;;  %v1696_v38 = vpop.eup %1695  ;;  %vm1152_vm13 = vweird.f32 %v1694_v21 }
 0xc61   :  { %v1184_v40 = vmul.f32 %v1696_v38, %v1182_v20  ;;  %vm1153_vm15 = vmor %vm1151_vm14, %vm1152_vm13  ;;  %vm1189_vm1 = vweird.f32 %v1696_v38 }
 0xc62   :  { %v1148_v37 = vsub.f32 1.0, %v1147_v36  ;;  %vm1190_vm3 = vmor %vm1188_vm2, %vm1189_vm1 }
 0xc63   :  { %v1185_v42 = vsub.f32 1.0, %v1184_v40 }
 0xc64   :  { %v1149_v39 = vmul.f32 %v1694_v21, %v1148_v37 }
 0xc65   :  { %v1186_v46 = vmul.f32 %v1696_v38, %v1185_v42 }
 0xc66   :  { %v1150_v41 = vadd.f32 %v1694_v21, %v1149_v39 }
 0xc67   :  { %v1187_v51 = vadd.f32 %v1696_v38, %v1186_v46 }
 0xc68   :  { %v1154_v45 = vsel %vm1153_vm15, %v1694_v21, %v1150_v41 }
 0xc69   :  { %v1159_v49 = vsel %vm1156_vm0, %v1158_v47, %v1154_v45  ;;  %v1191_v54 = vsel %vm1190_vm3, %v1696_v38, %v1187_v51 }
 0xc6a   :  { %v1196_v56 = vsel %vm1193_vm4, %v1195_v55, %v1191_v54  ;;  %v1162_v59 = vmul.f32 %v1159_v49, %v2097_v60 }
 0xc6b   :  { %v1199_v2 = vmul.f32 %v1196_v56, %v2101_v5 }
 0xca8   :  { %v1165_v48 = vpop.permute.xlu1 %1164 }
 0xca9   :  { %v1167_v50 = vmul.f32 %v1165_v48, %v1159_v49 }
 0xcab   :  { %1169 = vrot.lane.b32.xlu0 %v1167_v50, %s1872_s4 }
 0xcb0   :  { %v1202_v57 = vpop.permute.xlu2 %1201 }
 0xcb1   :  { %v1204_v58 = vmul.f32 %v1202_v57, %v1196_v56 }
 0xcb3   :  { %1206 = vrot.lane.b32.xlu1 %v1204_v58, %s1872_s4 }
 0xd1d   :  { %v1170_v62 = vpop.permute.xlu0 %1169 }
 0xd1e   :  { %v2119_v63 = vadd.f32 %v1170_v62, %v1162_v59 }
 0xd20   :  { %1697 = vtanh.f32 %v2119_v63 }
 0xd25   :  { %v1207_v9 = vpop.permute.xlu1 %1206 }
 0xd26   :  { %v1698_v0 = vpop.eup %1697  ;;  %v2123_v61 = vadd.f32 %v1207_v9, %v1199_v2 }
 0xd27   :  { %1175 = vrot.lane.b32.xlu2 %v1698_v0, %s1868_s13 }
 0xd28   :  { %1699 = vtanh.f32 %v2123_v61 }
 0xd2e   :  { %v1700_v8 = vpop.eup %1699 }
 0xd2f   :  { %1212 = vrot.lane.b32.xlu0 %v1700_v8, %s1868_s13 }
 0xd81   :  { %v1176_v3 = vpop.permute.xlu2 %1175 }
 0xd82   :  { %v1178_v60 = vmul.f32 %v1176_v3, %v1159_v49 }
 0xd84   :  { %v1231_v22 = vpack.c.bf16 %v1178_v60, %v1178_v60  ;;  %1217 = vst [vmem:[#allocation1] ss:$4 sm:$0xff] %v1178_v60 }
 0xd86   :  { %1233 = vrot.lane.b32.xlu1 %v1231_v22, %s1872_s4 }
 0xd8b   :  { %v2131_v24 = vld.sshfl [vmem:[#allocation1] sm:$0xff pattern:$0x73625140] }
 0xda1   :  { %v1213_v5 = vpop.permute.xlu0 %1212 }
 0xda2   :  { %v1215_v23 = vmul.f32 %v1213_v5, %v1196_v56 }
 0xda4   :  { %v1253_v25 = vpack.c.bf16 %v1215_v23, %v1215_v23  ;;  %1224 = vst [vmem:[#allocation1] ss:$4 sm:$0xff] %v1215_v23 }
 0xda6   :  { %1255 = vrot.lane.b32.xlu2 %v1253_v25, %s1872_s4 }
 0xdf8   :  { %v1234_v26 = vpop.permute.xlu1 %1233 }
 0xdf9   :  { %1577 = vmatmul.msk.bf16.vlgmr.msrb.gmra.mxu0 %vm428_vm10, %v1234_v26  ;;  %v2150_v26 = vld.sshfl [vmem:[#allocation1] sm:$0xff pattern:$0x73625140] }
 0xe00   :  { %v1256_v27 = vpop.permute.xlu2 %1255 }
 0xe01   :  { %1578 = vmatmul.msk.bf16.vlgmr.msrb.gmra.mxu1 %vm428_vm10, %v1256_v27 }
 0xe76   :  { %v1247_v29 = vpop.f32.mrf.mxu0 }
 0xe77   :  { %v1251_v30 = vadd.f32 %v1247_v29, %v1230_v28 }
 0xe79   :  { %1701 = vtanh.f32 %v1251_v30  ;;  %v1579_v34 = vmul.f32 -1.442695, %v1251_v30 }
 0xe7e   :  { %v1249_v31 = vpop.f32.mrf.mxu0  ;;  %v1269_v11 = vpop.f32.mrf.mxu1 }
 0xe7f   :  { %v1702_v14 = vpop.eup %1701  ;;  %v1273_v33 = vadd.f32 %v1269_v11, %v1252_v32  ;;  %v1362_v11 = vld [vmem:[#allocation2 + $0x1c] sm:$0x3] }
 0xe80   :  { %1296 = vrot.lane.b32.xlu0 %v1702_v14, %s1868_s13 }
 0xe81   :  { %1703 = vtanh.f32 %v1273_v33  ;;  %v1580_v35 = vmul.f32 -1.442695, %v1273_v33 }
 0xe82   :  { %1705 = vpow2.f32 %v1579_v34 }
 0xe83   :  { %1707 = vpow2.f32 %v1580_v35 }
 0xe86   :  { %v1271_v13 = vpop.f32.mrf.mxu1 }
 0xe87   :  { %v1704_v15 = vpop.eup %1703 }
 0xe88   :  { %1333 = vrot.lane.b32.xlu1 %v1704_v15, %s1868_s13  ;;  %v1706_v20 = vpop.eup %1705  ;;  %v1384_v15 = vld [vmem:[#allocation2 + $0x2] sm:$0x3] }
 0xe89   :  { %v1277_v21 = vadd.f32 1.0, %v1706_v20  ;;  %v1708_v36 = vpop.eup %1707 }
 0xe8a   :  { %v1314_v37 = vadd.f32 1.0, %v1708_v36 }
 0xe8b   :  { %1709 = vrcp.f32 %v1277_v21  ;;  %v1289_v46 = vand.u32 2147483648, %v1277_v21  ;;  %vm1283_vm6 = vweird.f32 %v1277_v21  ;;  %v1287_v47 = vand.u32 2147483647, %v1277_v21 }
 0xe8c   :  { %1711 = vrcp.f32 %v1314_v37  ;;  %v1326_v55 = vand.u32 2147483648, %v1314_v37  ;;  %vm1320_vm11 = vweird.f32 %v1314_v37  ;;  %v1324_v56 = vand.u32 2147483647, %v1314_v37 }
 0xe8d   :  { %v1290_v50 = vor.u32 1.1754944e-38, %v1289_v46  ;;  %vm1288_vm8 = vcmp.eq.f32.partialorder %v1287_v47, 8.507059e+37 }
 0xe8e   :  { %v1327_v58 = vor.u32 1.1754944e-38, %v1326_v55  ;;  %vm1325_vm13 = vcmp.eq.f32.partialorder %v1324_v56, 8.507059e+37 }
 0xe91   :  { %v1710_v38 = vpop.eup %1709 }
 0xe92   :  { %v1279_v39 = vmul.f32 %v1710_v38, %v1277_v21  ;;  %v1712_v41 = vpop.eup %1711  ;;  %vm1284_vm5 = vweird.f32 %v1710_v38 }
 0xe93   :  { %v1316_v43 = vmul.f32 %v1712_v41, %v1314_v37  ;;  %vm1285_vm7 = vmor %vm1283_vm6, %vm1284_vm5  ;;  %vm1321_vm9 = vweird.f32 %v1712_v41  ;;  %vm553_vm5 = vcmask 254976   ;;  %vm562_vm6 = vcmask 517376  }
 0xe94   :  { %v1280_v40 = vsub.f32 1.0, %v1279_v39  ;;  %vm1322_vm12 = vmor %vm1320_vm11, %vm1321_vm9 }
 0xe95   :  { %v1317_v45 = vsub.f32 1.0, %v1316_v43 }
 0xe96   :  { %v1281_v42 = vmul.f32 %v1710_v38, %v1280_v40 }
 0xe97   :  { %v1318_v49 = vmul.f32 %v1712_v41, %v1317_v45 }
 0xe98   :  { %v1282_v44 = vadd.f32 %v1710_v38, %v1281_v42 }
 0xe99   :  { %v1319_v54 = vadd.f32 %v1712_v41, %v1318_v49 }
 0xe9a   :  { %v1286_v48 = vsel %vm1285_vm7, %v1710_v38, %v1282_v44 }
 0xe9b   :  { %v1291_v52 = vsel %vm1288_vm8, %v1290_v50, %v1286_v48  ;;  %v1323_v57 = vsel %vm1322_vm12, %v1712_v41, %v1319_v54 }
 0xe9c   :  { %v1328_v62 = vsel %vm1325_vm13, %v1327_v58, %v1323_v57  ;;  %v1294_v9 = vmul.f32 %v1291_v52, %v2119_v63 }
 0xe9d   :  { %v1331_v60 = vmul.f32 %v1328_v62, %v2123_v61 }
 0xef2   :  { %v1297_v51 = vpop.permute.xlu0 %1296 }
 0xef3   :  { %v1299_v53 = vmul.f32 %v1297_v51, %v1291_v52 }
 0xef5   :  { %1301 = vrot.lane.b32.xlu2 %v1299_v53, %s1872_s4 }
 0xefa   :  { %v1334_v59 = vpop.permute.xlu1 %1333 }
 0xefb   :  { %v1336_v2 = vmul.f32 %v1334_v59, %v1328_v62 }
 0xefd   :  { %1338 = vrot.lane.b32.xlu0 %v1336_v2, %s1872_s4 }
 0xf4f   :  { %v1302_v0 = vpop.permute.xlu2 %1301 }
 0xf50   :  { %v2141_v8 = vadd.f32 %v1302_v0, %v1294_v9 }
 0xf52   :  { %1713 = vtanh.f32 %v2141_v8 }
 0xf58   :  { %v1714_v3 = vpop.eup %1713 }
 0xf59   :  { %1307 = vrot.lane.b32.xlu1 %v1714_v3, %s1868_s13 }
 0xf6f   :  { %v1339_v22 = vpop.permute.xlu0 %1338 }
 0xf70   :  { %v2146_v5 = vadd.f32 %v1339_v22, %v1331_v60 }
 0xf72   :  { %1715 = vtanh.f32 %v2146_v5 }
 0xf78   :  { %v1716_v23 = vpop.eup %1715 }
 0xf79   :  { %1344 = vrot.lane.b32.xlu2 %v1716_v23, %s1868_s13 }
 0xfcb   :  { %v1308_v25 = vpop.permute.xlu1 %1307 }
 0xfcc   :  { %v1310_v63 = vmul.f32 %v1308_v25, %v1291_v52 }
 0xfce   :  { %v1363_v27 = vpack.c.bf16 %v1310_v63, %v1310_v63  ;;  %1349 = vst [vmem:[#allocation1] ss:$4 sm:$0xff] %v1310_v63 }
 0xfd0   :  { %1365 = vrot.lane.b32.xlu0 %v1363_v27, %s1872_s4 }
 0xfd3   :  { %v1345_v28 = vpop.permute.xlu2 %1344 }
 0xfd4   :  { %v1347_v29 = vmul.f32 %v1345_v28, %v1328_v62 }
 0xfd5   :  { %v2153_v30 = vld.sshfl [vmem:[#allocation1] sm:$0xff pattern:$0x73625140] }
 0xfd6   :  { %v1385_v61 = vpack.c.bf16 %v1347_v29, %v1347_v29  ;;  %1356 = vst [vmem:[#allocation1] ss:$4 sm:$0xff] %v1347_v29 }
 0xfd8   :  { %1387 = vrot.lane.b32.xlu1 %v1385_v61, %s1872_s4 }
0x1042   :  { %v1366_v31 = vpop.permute.xlu0 %1365 }
0x1043   :  { %1581 = vmatmul.msk.bf16.vlgmr.msrb.gmra.mxu2 %vm428_vm10, %v1366_v31 }
0x104a   :  { %v1388_v32 = vpop.permute.xlu1 %1387 }
0x104b   :  { %1582 = vmatmul.msk.bf16.vlgmr.msrb.gmra.mxu3 %vm428_vm10, %v1388_v32 }
0x10c6   :  { %v1379_v14 = vpop.f32.mrf.mxu2 }
0x10c7   :  { %v1383_v33 = vadd.f32 %v1379_v14, %v1362_v11 }
0x10c9   :  { %1717 = vtanh.f32 %v1383_v33  ;;  %v1583_v37 = vmul.f32 -1.442695, %v1383_v33 }
0x10ce   :  { %v1381_v13 = vpop.f32.mrf.mxu2  ;;  %v1401_v34 = vpop.f32.mrf.mxu3 }
0x10cf   :  { %v1718_v35 = vpop.eup %1717  ;;  %v1405_v20 = vadd.f32 %v1401_v34, %v1384_v15 }
0x10d0   :  { %1428 = vrot.lane.b32.xlu2 %v1718_v35, %s1868_s13 }
0x10d1   :  { %1719 = vtanh.f32 %v1405_v20  ;;  %v1584_v43 = vmul.f32 -1.442695, %v1405_v20 }
0x10d2   :  { %1721 = vpow2.f32 %v1583_v37 }
0x10d6   :  { %v1403_v21 = vpop.f32.mrf.mxu3 }
0x10d7   :  { %v1720_v36 = vpop.eup %1719 }
0x10d8   :  { %1465 = vrot.lane.b32.xlu0 %v1720_v36, %s1868_s13  ;;  %v1722_v38 = vpop.eup %1721 }
0x10d9   :  { %v1409_v39 = vadd.f32 1.0, %v1722_v38 }
0x10db   :  { %1723 = vrcp.f32 %v1409_v39  ;;  %v1421_v46 = vand.u32 2147483648, %v1409_v39  ;;  %vm1415_vm14 = vweird.f32 %v1409_v39  ;;  %v1419_v47 = vand.u32 2147483647, %v1409_v39 }
0x10dc   :  { %1725 = vpow2.f32 %v1584_v43 }
0x10dd   :  { %v1422_v50 = vor.u32 1.1754944e-38, %v1421_v46  ;;  %vm1420_vm0 = vcmp.eq.f32.partialorder %v1419_v47, 8.507059e+37 }
0x10e1   :  { %v1724_v40 = vpop.eup %1723 }
0x10e2   :  { %v1411_v41 = vmul.f32 %v1724_v40, %v1409_v39  ;;  %vm1416_vm10 = vweird.f32 %v1724_v40  ;;  %v1726_v48 = vpop.eup %1725 }
0x10e3   :  { %vm1417_vm15 = vmor %vm1415_vm14, %vm1416_vm10  ;;  %v1446_v51 = vadd.f32 1.0, %v1726_v48 }
0x10e4   :  { %v1412_v42 = vsub.f32 1.0, %v1411_v41 }
0x10e5   :  { %1727 = vrcp.f32 %v1446_v51  ;;  %v1458_v62 = vand.u32 2147483648, %v1446_v51  ;;  %vm1452_vm2 = vweird.f32 %v1446_v51  ;;  %v1456_v2 = vand.u32 2147483647, %v1446_v51 }
0x10e6   :  { %v1413_v44 = vmul.f32 %v1724_v40, %v1412_v42 }
0x10e7   :  { %v1459_v0 = vor.u32 1.1754944e-38, %v1458_v62  ;;  %vm1457_vm4 = vcmp.eq.f32.partialorder %v1456_v2, 8.507059e+37 }
0x10e8   :  { %v1414_v45 = vadd.f32 %v1724_v40, %v1413_v44 }
0x10ea   :  { %v1418_v49 = vsel %vm1417_vm15, %v1724_v40, %v1414_v45 }
0x10eb   :  { %v1423_v52 = vsel %vm1420_vm0, %v1422_v50, %v1418_v49  ;;  %v1728_v55 = vpop.eup %1727 }
0x10ec   :  { %v1448_v56 = vmul.f32 %v1728_v55, %v1446_v51  ;;  %vm1453_vm1 = vweird.f32 %v1728_v55  ;;  %v1426_v23 = vmul.f32 %v1423_v52, %v2141_v8 }
0x10ed   :  { %vm1454_vm3 = vmor %vm1452_vm2, %vm1453_vm1 }
0x10ee   :  { %v1449_v57 = vsub.f32 1.0, %v1448_v56 }
0x10f0   :  { %v1450_v58 = vmul.f32 %v1728_v55, %v1449_v57 }
0x10f2   :  { %v1451_v59 = vadd.f32 %v1728_v55, %v1450_v58 }
0x10f4   :  { %v1455_v9 = vsel %vm1454_vm3, %v1728_v55, %v1451_v59 }
0x10f5   :  { %v1460_v60 = vsel %vm1457_vm4, %v1459_v0, %v1455_v9 }
0x10f6   :  { %v1463_v27 = vmul.f32 %v1460_v60, %v2146_v5 }
0x112a   :  { %v1429_v53 = vpop.permute.xlu2 %1428 }
0x112b   :  { %v1431_v54 = vmul.f32 %v1429_v53, %v1423_v52 }
0x112d   :  { %1433 = vrot.lane.b32.xlu1 %v1431_v54, %s1872_s4 }
0x114a   :  { %v1466_v3 = vpop.permute.xlu0 %1465 }
0x114b   :  { %v1468_v22 = vmul.f32 %v1466_v3, %v1460_v60 }
0x114d   :  { %1470 = vrot.lane.b32.xlu2 %v1468_v22, %s1872_s4 }
0x1155   :  { %550 = vrot.lane.b32.xlu2 %v2009_v19, %s1872_s4 }
0x115d   :  { %693 = vrot.lane.b32.xlu2 %v2058_v12, %s1868_s13 }
0x1165   :  { %953 = vrot.lane.b32.xlu2 %v2087_v16, %s1872_s4 }
0x116d   :  { %1094 = vrot.lane.b32.xlu2 %v2128_v6, %s1868_s13 }
0x1175   :  { %1351 = vrot.lane.b32.xlu2 %v2153_v30, %s1872_s4 }
0x119f   :  { %v1434_v25 = vpop.permute.xlu1 %1433 }
0x11a0   :  { %v1436_v63 = vadd.f32 %v1434_v25, %v1426_v23 }
0x11a2   :  { %1729 = vtanh.f32 %v1436_v63 }
0x11a7   :  { %v1471_v19 = vpop.permute.xlu2 %1470 }
0x11a8   :  { %v1730_v28 = vpop.eup %1729  ;;  %v1473_v29 = vadd.f32 %v1471_v19, %v1463_v27 }
0x11a9   :  { %1439 = vrot.lane.b32.xlu0 %v1730_v28, %s1868_s13 }
0x11aa   :  { %1731 = vtanh.f32 %v1473_v29 }
0x11af   :  { %v551_v12 = vpop.permute.xlu2 %550 }
0x11b0   :  { %v1732_v16 = vpop.eup %1731  ;;  %554 = vst.msk [vmem:[#allocation11] sm:$0x3] %vm553_vm5, %v551_v12 }
0x11b1   :  { %558 = vrot.lane.b32.xlu0 %v2032_v10, %s1868_s13  ;;  %1476 = vrot.lane.b32.xlu1 %v1732_v16, %s1868_s13 }
0x11b7   :  { %v694_v6 = vpop.permute.xlu2 %693 }
0x11b8   :  { %697 = vst.msk [vmem:[#allocation11 + $0xc] sm:$0x3] %vm562_vm6, %v694_v6 }
0x11b9   :  { %819 = vrot.lane.b32.xlu0 %v2061_v18, %s1872_s4  ;;  %685 = vrot.lane.b32.xlu1 %v2035_v17, %s1872_s4  ;;  %v1357_v17 = vld.sshfl [vmem:[#allocation1] sm:$0xff pattern:$0x73625140] }
0x11bf   :  { %v954_v8 = vpop.permute.xlu2 %953 }
0x11c0   :  { %957 = vst.msk [vmem:[#allocation11 + $0x6] sm:$0x3] %vm553_vm5, %v954_v8 }
0x11c1   :  { %961 = vrot.lane.b32.xlu0 %v2106_v1, %s1868_s13  ;;  %827 = vrot.lane.b32.xlu1 %v2084_v4, %s1868_s13 }
0x11c7   :  { %v1095_v10 = vpop.permute.xlu2 %1094 }
0x11c8   :  { %1097 = vst.msk [vmem:[#allocation11 + $0x6] sm:$0x3] %vm562_vm6, %v1095_v10 }
0x11c9   :  { %1219 = vrot.lane.b32.xlu0 %v2131_v24, %s1872_s4  ;;  %1087 = vrot.lane.b32.xlu1 %v2109_v7, %s1872_s4 }
0x11cf   :  { %v1352_v18 = vpop.permute.xlu2 %1351 }
0x11d0   :  { %1354 = vst.msk [vmem:[#allocation11 + $0xc] sm:$0x3] %vm553_vm5, %v1352_v18 }
0x11d1   :  { %1358 = vrot.lane.b32.xlu0 %v1357_v17, %s1868_s13  ;;  %1226 = vrot.lane.b32.xlu1 %v2150_v26, %s1868_s13 }
0x121b   :  { %v1440_v1 = vpop.permute.xlu0 %1439 }
0x121c   :  { %v1442_v4 = vmul.f32 %v1440_v1, %v1423_v52 }
0x121e   :  { %1481 = vst [vmem:[#allocation1] ss:$4 sm:$0xff] %v1442_v4 }
0x1223   :  { %v559_v5 = vpop.permute.xlu0 %558  ;;  %v1477_v30 = vpop.permute.xlu1 %1476 }
0x1224   :  { %563 = vst.msk [vmem:[#allocation11 + $0xe] sm:$0x3] %vm562_vm6, %v559_v5  ;;  %v1479_v24 = vmul.f32 %v1477_v30, %v1460_v60 }
0x1225   :  { %v1482_v61 = vld.sshfl [vmem:[#allocation1] sm:$0xff pattern:$0x73625140] }
0x1226   :  { %1483 = vrot.lane.b32.xlu1 %v1482_v61, %s1872_s4  ;;  %1488 = vst [vmem:[#allocation1] ss:$4 sm:$0xff] %v1479_v24 }
0x122b   :  { %v820_v7 = vpop.permute.xlu0 %819  ;;  %v686_v31 = vpop.permute.xlu1 %685 }
0x122c   :  { %823 = vst.msk [vmem:[#allocation11 + $0x4] sm:$0x3] %vm553_vm5, %v820_v7 }
0x122d   :  { %689 = vst.msk [vmem:[#allocation11 + $0x2] sm:$0x3] %vm553_vm5, %v686_v31  ;;  %v1489_v32 = vld.sshfl [vmem:[#allocation1] sm:$0xff pattern:$0x73625140] }
0x122e   :  { %1490 = vrot.lane.b32.xlu2 %v1489_v32, %s1868_s13 }
0x1233   :  { %v962_v26 = vpop.permute.xlu0 %961  ;;  %v828_v11 = vpop.permute.xlu1 %827 }
0x1234   :  { %965 = vst.msk [vmem:[#allocation11 + $0x8] sm:$0x3] %vm562_vm6, %v962_v26 }
0x1235   :  { %831 = vst.msk [vmem:[#allocation11 + $0xa] sm:$0x3] %vm562_vm6, %v828_v11 }
0x123b   :  { %v1220_v14 = vpop.permute.xlu0 %1219  ;;  %v1088_v33 = vpop.permute.xlu1 %1087 }
0x123c   :  { %1222 = vst.msk [vmem:[#allocation11 + $0xa] sm:$0x3] %vm553_vm5, %v1220_v14 }
0x123d   :  { %1090 = vst.msk [vmem:[#allocation11 + $0x8] sm:$0x3] %vm553_vm5, %v1088_v33 }
0x1243   :  { %v1359_v13 = vpop.permute.xlu0 %1358  ;;  %v1227_v15 = vpop.permute.xlu1 %1226 }
0x1244   :  { %1361 = vst.msk [vmem:[#allocation11 + $0x2] sm:$0x3] %vm562_vm6, %v1359_v13 }
0x1245   :  { %1229 = vst.msk [vmem:[#allocation11 + $0x4] sm:$0x3] %vm562_vm6, %v1227_v15 }
0x1288   :  { %v1491_v34 = vpop.permute.xlu2 %1490 }
0x1289   :  { %1493 = vst.msk [vmem:[#allocation11] sm:$0x3] %vm562_vm6, %v1491_v34 }
0x1298   :  { %v1484_v35 = vpop.permute.xlu1 %1483 }
0x1299   :  { %1486 = vst.msk [vmem:[#allocation11 + $0xe] sm:$0x3] %vm553_vm5, %v1484_v35 }
0x129a   :  { %1506 = dma.vmem_to_hbm [thread:$0]  %s1499_s18, 256, %s1501_s21, [#allocation5], %s1872_s4, %s1872_s4, %s1874_s22  }
0x129b   :  { %1859 = dma.done.wait [#allocation5], 256  }
0x129c   :  { %1860 = vsyncadd [#allocation5], 4294967040 }
0x129d   :  { %1511 = vsyncpa [#allocation4], 1 }
0x129e   :  { %1512 = vsyncpa [#allocation7], 1 }
0x129f   :  { %1513 = vsyncpa [#allocation10], 1 }
0x12a0   :  { %1514 = vsyncpa [#allocation5], 1 }

</bundles_post_ra>
